<compile_context>
chip_gen: v6e
topology: v6e:2x2x1
jax: 0.10.0
libtpu: 0.0.40
codegen_flags: <defaults>
</compile_context>

<pallas_src>
import functools

import jax
import jax.numpy as jnp
from jax.experimental import pallas as pl
from jax.experimental.pallas import tpu as pltpu

K = 7          # conv kernel size (module default)
PAD = 3        # padding for kernel_size == 7


def _range_mask(idx, lo, hi, size):
    """(1, HW) mask for lo <= idx < hi; None means the full range (no mask)."""
    m = None
    if lo > 0:
        m = idx >= lo
    if hi < size:
        m = (idx < hi) if m is None else (m & (idx < hi))
    return m


def _conv_sigmoid_store(s_plane, m_plane, w_ref, col_ref, o_ref, *, H, W):
    """Separable 7x7 zero-padded cross-correlation over [avg, max] + sigmoid.

    s_plane : (B, H*W) f32   channel-sum plane (avg taps pre-scaled by 1/C)
    m_plane : (B, H*W) f32   channel-max plane
    w_ref   : (2*K*K,) SMEM  flattened conv weight (channel, ky, kx)
    col_ref : (1, H*W) VMEM  int32 column index of each flat position
    o_ref   : (1, B, H*W)    output block (lane-dense on H*W)
    """
    HW = H * W
    col = col_ref[...]                                       # (1, HW)
    flat = jax.lax.broadcasted_iota(jnp.int32, (1, HW), 1)   # (1, HW)

    # Pass 1: one column roll (+ one (1,HW) col mask) per dx, shared by all dy.
    shifted = []
    for dx in range(K):
        o = dx - PAD
        shift = (-o) % HW
        if shift == 0:
            a, m = s_plane, m_plane
        else:
            a = pltpu.roll(s_plane, shift, axis=1)
            m = pltpu.roll(m_plane, shift, axis=1)
        cmask = _range_mask(col, max(0, -o), min(W, W - o), W)
        if cmask is not None:
            a = jnp.where(cmask, a, 0.0)
            m = jnp.where(cmask, m, 0.0)
        shifted.append((a, m))

    # Pass 2: per-dy weighted sum over dx (VPU MACs), then a single row roll
    # of (dy-PAD)*W and one (1,HW) row-validity mask before accumulating.
    acc = jnp.zeros_like(s_plane)
    for dy in range(K):
        o = dy - PAD
        row_acc = None
        for dx in range(K):
            a, m = shifted[dx]
            t = w_ref[dy * K + dx] * a + w_ref[K * K + dy * K + dx] * m
            row_acc = t if row_acc is None else row_acc + t
        shift = (-o * W) % HW
        if shift != 0:
            row_acc = pltpu.roll(row_acc, shift, axis=1)
        rmask = _range_mask(flat, max(0, -o) * W, min(H, H - o) * W, HW)
        if rmask is not None:
            row_acc = jnp.where(rmask, row_acc, 0.0)
        acc = acc + row_acc

    o_ref[0] = jax.nn.sigmoid(acc).astype(o_ref.dtype)


def _spatial_attention_kernel(x_ref, col_ref, w_ref, o_ref, sum_ref, max_ref,
                              *, H, W, c_real, c_tile, n_c):
    # x_ref   : (B, C_TILE, H*W) VMEM  input block (batch block x channel tile)
    # col_ref : (1, H*W)         VMEM  int32, col_ref[0, i] = i % W
    # w_ref   : (2*K*K,)         SMEM  flattened conv weight (avg scaled 1/C)
    # o_ref   : (1, B, H*W)      VMEM  output attention map (lane-dense)
    # sum_ref : (B, H*W) f32     VMEM  running channel sum
    # max_ref : (B, H*W) f32     VMEM  running channel max
    c = pl.program_id(1)
    x_nat = x_ref[...]                                        # native dtype

    # Channel partials: f32 accumulation for the sum, native-dtype max.
    part_sum = jnp.sum(x_nat, axis=1, dtype=jnp.float32)      # (B, HW)
    if n_c * c_tile > c_real:
        # Channels were zero-padded to a multiple of the tile: neutral for the
        # sum, but must not win the max -> mask padded channels to -inf.
        ch = (jax.lax.broadcasted_iota(jnp.int32, (1, c_tile, 1), 1)
              + c * c_tile)
        x_for_max = jnp.where(ch < c_real, x_nat,
                              jnp.asarray(-jnp.inf, x_nat.dtype))
    else:
        x_for_max = x_nat
    part_max = jnp.max(x_for_max, axis=1).astype(jnp.float32)  # (B, HW)

    if n_c == 1:
        # Single channel step: fold straight into the finalize, no scratch.
        _conv_sigmoid_store(part_sum, part_max, w_ref, col_ref, o_ref, H=H, W=W)
    else:
        @pl.when(c == 0)
        def _():
            sum_ref[...] = part_sum
            max_ref[...] = part_max

        if n_c > 2:
            @pl.when(jnp.logical_and(c > 0, c < n_c - 1))
            def _():
                sum_ref[...] = sum_ref[...] + part_sum
                max_ref[...] = jnp.maximum(max_ref[...], part_max)

        @pl.when(c == n_c - 1)
        def _():
            # Fold this step's partials directly into the finalize (saves a
            # full-plane store + immediate reload of the running planes).
            total_sum = sum_ref[...] + part_sum
            total_max = jnp.maximum(max_ref[...], part_max)
            _conv_sigmoid_store(total_sum, total_max, w_ref, col_ref, o_ref,
                                H=H, W=W)


def _pick_batch_block(n, cap):
    """Largest batch block that divides n and respects cap (leading dim, so no
    sublane-divisibility requirement)."""
    cap = max(1, min(n, cap))
    for d in range(cap, 0, -1):
        if n % d == 0:
            return d
    return 1


def _pick_channel_tiling(c, cap):
    """(c_padded, c_tile): either untiled (c_tile == c) or c_tile a multiple
    of 8 that is <= max(cap, 8) and divides c_padded; minimizes padding."""
    if c <= cap:
        return c, c
    cap8 = max(8, (cap // 8) * 8)
    best_key, best_t = None, 8
    for t in range(cap8, 0, -8):
        key = ((-c) % t, -t)                 # (padding, prefer larger tile)
        if best_key is None or key < best_key:
            best_key, best_t = key, t
    return c + ((-c) % best_t), best_t


@jax.jit
def spatial_attention(x, w):
    """x: (N, C, H, W); w: (2, K, K) conv weight (out=1, no bias) -> (N,1,H,W)."""
    N, C, H, W = x.shape
    HW = H * W
    hw_pad = ((HW + 127) // 128) * 128
    itemsize = jnp.dtype(x.dtype).itemsize

    # Batch block:
    #  * >= 2 batch grid steps whenever N >= 2 so v7x's two TensorCores both
    #    get work on the "parallel" axis (harmless on 1-TC v5e/v6e).
    #  * bound b_blk*H*W (~2K f32 elems) so the ~18 live planes in the
    #    finalize stay inside the 64-vreg (256 KiB) register file (no spills).
    # TODO(synk): H*W > ~2K per batch row would additionally want H-strip
    # tiling of the conv with a 6-row halo; not needed for these shapes.
    b_cap = min(max(1, N // 2), max(1, 2048 // hw_pad)) if N > 1 else 1
    b_blk = _pick_batch_block(N, b_cap)
    nb = N // b_blk

    # Channel tile: ~8 MiB per input block (double-buffered -> 16 MiB), large
    # enough to sit on the HBM roofline yet safe within v7x's 64 MiB VMEM.
    c_cap = max(1, (8 << 20) // max(1, b_blk * hw_pad * itemsize))
    c_pad, c_tile = _pick_channel_tiling(C, c_cap)
    n_c = c_pad // c_tile

    x_flat = x.reshape(N, C, HW)                               # lane dim = H*W
    if c_pad != C:
        x_flat = jnp.pad(x_flat, ((0, 0), (0, c_pad - C), (0, 0)))

    col_idx = (jnp.arange(HW, dtype=jnp.int32) % W).reshape(1, HW)

    # Flatten conv weight (channel-major) and fold the channel-mean 1/C into
    # the avg-channel taps (removes one full-plane multiply per batch block).
    w_f32 = w.astype(jnp.float32)
    w_flat = jnp.concatenate([w_f32[0].reshape(-1) / C, w_f32[1].reshape(-1)])

    kernel = functools.partial(_spatial_attention_kernel,
                               H=H, W=W, c_real=C, c_tile=c_tile, n_c=n_c)

    out = pl.pallas_call(
        kernel,
        # Output grouped as (batch step, batch block, H*W): lane-dense store,
        # and b_blk stays a leading dim so it never hits the (8,128) rule.
        out_shape=jax.ShapeDtypeStruct((nb, b_blk, HW), x.dtype),
        grid_spec=pltpu.PrefetchScalarGridSpec(
            num_scalar_prefetch=0,
            grid=(nb, n_c),                                    # C axis last
            in_specs=[
                pl.BlockSpec((b_blk, c_tile, HW), lambda n, c: (n, c, 0)),
                pl.BlockSpec((1, HW), lambda n, c: (0, 0)),
                pl.BlockSpec(memory_space=pltpu.MemorySpace.SMEM),
            ],
            out_specs=pl.BlockSpec((1, b_blk, HW), lambda n, c: (n, 0, 0)),
            scratch_shapes=[
                pltpu.VMEM((b_blk, HW), jnp.float32),          # running sum
                pltpu.VMEM((b_blk, HW), jnp.float32),          # running max
            ],
        ),
        compiler_params=pltpu.CompilerParams(
            dimension_semantics=("parallel", "arbitrary"),
            vmem_limit_bytes=40 * 1024 * 1024),
    )(x_flat, col_idx, w_flat)

    return out.reshape(N, 1, H, W)


def _reference(x, w):
    """Pure-JAX reference mirroring the PyTorch forward."""
    avg = jnp.mean(x, axis=1, keepdims=True)
    mx = jnp.max(x, axis=1, keepdims=True)
    cat = jnp.concatenate([avg, mx], axis=1)                   # (N, 2, H, W)
    y = jax.lax.conv_general_dilated(
        cat, w[None],                                          # (1, 2, K, K)
        window_strides=(1, 1),
        padding=((PAD, PAD), (PAD, PAD)),
        dimension_numbers=("NCHW", "OIHW", "NCHW"))
    return jax.nn.sigmoid(y)


if __name__ == "__main__":
    key = jax.random.PRNGKey(0)
    kx, kw = jax.random.split(key)

    # Small deterministic inputs: batch=2, channels=4, spatial=16x16.
    x = jax.random.normal(kx, (2, 4, 16, 16), dtype=jnp.float32)

    # Deterministic conv weight init, matching PyTorch Conv2d default
    # (kaiming-uniform bound = 1/sqrt(fan_in), fan_in = 2*7*7).
    bound = 1.0 / (2 * K * K) ** 0.5
    w = jax.random.uniform(kw, (2, K, K), minval=-bound, maxval=bound,
                           dtype=jnp.float32)

    out = jax.block_until_ready(spatial_attention(x, w))

    ref = _reference(x, w)
    assert out.shape == (2, 1, 16, 16), out.shape
    err = float(jnp.max(jnp.abs(out - ref)))
    assert jnp.allclose(out, ref, atol=1e-5, rtol=1e-5), err

    print("KERNEL_OK")
</pallas_src>

<mosaic_0001>
module attributes {stable_mosaic.version = 11 : i64} {
  func.func @_spatial_attention_kernel(%arg0: i32, %arg1: i32, %arg2: memref<1x4x256xf32, #tpu.memory_space<vmem>>, %arg3: memref<1x256xi32, #tpu.memory_space<vmem>>, %arg4: memref<98xf32, #tpu.memory_space<smem>>, %arg5: memref<1x1x256xf32, #tpu.memory_space<vmem>>, %arg6: memref<1x256xf32, #tpu.memory_space<vmem>>, %arg7: memref<1x256xf32, #tpu.memory_space<vmem>>) attributes {dimension_semantics = [#tpu.dimension_semantics<parallel>, #tpu.dimension_semantics<arbitrary>], iteration_bounds = array<i64: 2, 1>, scalar_prefetch = 0 : i64, scratch_operands = 2 : i64, tpu.core_type = #tpu.core_type<tc>, window_params = [{transform_indices = @transform_0, window_bounds = array<i64: 1, 4, 256>}, {pipeline_mode = #tpu.pipeline_mode<synchronous>, transform_indices = @transform_1, window_bounds = array<i64: 1, 256>}, {transform_indices = @transform_2, window_bounds = array<i64: 98>}, {transform_indices = @transform_3, window_bounds = array<i64: 1, 1, 256>}]} {
    %c0 = arith.constant 0 : index
    %c0_0 = arith.constant 0 : index
    %c0_1 = arith.constant 0 : index
    %0 = vector.load %arg2[%c0, %c0_0, %c0_1] : memref<1x4x256xf32, #tpu.memory_space<vmem>>, vector<1x4x256xf32>
    %cst = arith.constant dense<0.000000e+00> : vector<1x256xf32>
    %1 = vector.multi_reduction <add>, %0, %cst [1] : vector<1x4x256xf32> to vector<1x256xf32>
    %cst_2 = arith.constant dense<0xFF800000> : vector<1x256xf32>
    %2 = vector.multi_reduction <maximumf>, %0, %cst_2 [1] : vector<1x4x256xf32> to vector<1x256xf32>
    %c0_3 = arith.constant 0 : index
    %c0_4 = arith.constant 0 : index
    %3 = vector.load %arg3[%c0_3, %c0_4] : memref<1x256xi32, #tpu.memory_space<vmem>>, vector<1x256xi32>
    %4 = tpu.iota {dimensions = array<i32: 1>} : vector<1x256xi32>
    %c3_i32 = arith.constant 3 : i32
    %5 = tpu.dynamic_rotate %1 by %c3_i32 dim 1 : vector<1x256xf32>, i32 -> vector<1x256xf32>
    %c3_i32_5 = arith.constant 3 : i32
    %6 = tpu.dynamic_rotate %2 by %c3_i32_5 dim 1 : vector<1x256xf32>, i32 -> vector<1x256xf32>
    %c3_i32_6 = arith.constant 3 : i32
    %7 = vector.broadcast %c3_i32_6 : i32 to vector<1x256xi32>
    %8 = arith.cmpi sge, %3, %7 : vector<1x256xi32>
    %cst_7 = arith.constant 0.000000e+00 : f32
    %9 = vector.broadcast %cst_7 : f32 to vector<1x256xf32>
    %10 = arith.select %8, %5, %9 : vector<1x256xi1>, vector<1x256xf32>
    %cst_8 = arith.constant 0.000000e+00 : f32
    %11 = vector.broadcast %cst_8 : f32 to vector<1x256xf32>
    %12 = arith.select %8, %6, %11 : vector<1x256xi1>, vector<1x256xf32>
    %c2_i32 = arith.constant 2 : i32
    %13 = tpu.dynamic_rotate %1 by %c2_i32 dim 1 : vector<1x256xf32>, i32 -> vector<1x256xf32>
    %c2_i32_9 = arith.constant 2 : i32
    %14 = tpu.dynamic_rotate %2 by %c2_i32_9 dim 1 : vector<1x256xf32>, i32 -> vector<1x256xf32>
    %c2_i32_10 = arith.constant 2 : i32
    %15 = vector.broadcast %c2_i32_10 : i32 to vector<1x256xi32>
    %16 = arith.cmpi sge, %3, %15 : vector<1x256xi32>
    %cst_11 = arith.constant 0.000000e+00 : f32
    %17 = vector.broadcast %cst_11 : f32 to vector<1x256xf32>
    %18 = arith.select %16, %13, %17 : vector<1x256xi1>, vector<1x256xf32>
    %cst_12 = arith.constant 0.000000e+00 : f32
    %19 = vector.broadcast %cst_12 : f32 to vector<1x256xf32>
    %20 = arith.select %16, %14, %19 : vector<1x256xi1>, vector<1x256xf32>
    %c1_i32 = arith.constant 1 : i32
    %21 = tpu.dynamic_rotate %1 by %c1_i32 dim 1 : vector<1x256xf32>, i32 -> vector<1x256xf32>
    %c1_i32_13 = arith.constant 1 : i32
    %22 = tpu.dynamic_rotate %2 by %c1_i32_13 dim 1 : vector<1x256xf32>, i32 -> vector<1x256xf32>
    %c1_i32_14 = arith.constant 1 : i32
    %23 = vector.broadcast %c1_i32_14 : i32 to vector<1x256xi32>
    %24 = arith.cmpi sge, %3, %23 : vector<1x256xi32>
    %cst_15 = arith.constant 0.000000e+00 : f32
    %25 = vector.broadcast %cst_15 : f32 to vector<1x256xf32>
    %26 = arith.select %24, %21, %25 : vector<1x256xi1>, vector<1x256xf32>
    %cst_16 = arith.constant 0.000000e+00 : f32
    %27 = vector.broadcast %cst_16 : f32 to vector<1x256xf32>
    %28 = arith.select %24, %22, %27 : vector<1x256xi1>, vector<1x256xf32>
    %c255_i32 = arith.constant 255 : i32
    %29 = tpu.dynamic_rotate %1 by %c255_i32 dim 1 : vector<1x256xf32>, i32 -> vector<1x256xf32>
    %c255_i32_17 = arith.constant 255 : i32
    %30 = tpu.dynamic_rotate %2 by %c255_i32_17 dim 1 : vector<1x256xf32>, i32 -> vector<1x256xf32>
    %c15_i32 = arith.constant 15 : i32
    %31 = vector.broadcast %c15_i32 : i32 to vector<1x256xi32>
    %32 = arith.cmpi slt, %3, %31 : vector<1x256xi32>
    %cst_18 = arith.constant 0.000000e+00 : f32
    %33 = vector.broadcast %cst_18 : f32 to vector<1x256xf32>
    %34 = arith.select %32, %29, %33 : vector<1x256xi1>, vector<1x256xf32>
    %cst_19 = arith.constant 0.000000e+00 : f32
    %35 = vector.broadcast %cst_19 : f32 to vector<1x256xf32>
    %36 = arith.select %32, %30, %35 : vector<1x256xi1>, vector<1x256xf32>
    %c254_i32 = arith.constant 254 : i32
    %37 = tpu.dynamic_rotate %1 by %c254_i32 dim 1 : vector<1x256xf32>, i32 -> vector<1x256xf32>
    %c254_i32_20 = arith.constant 254 : i32
    %38 = tpu.dynamic_rotate %2 by %c254_i32_20 dim 1 : vector<1x256xf32>, i32 -> vector<1x256xf32>
    %c14_i32 = arith.constant 14 : i32
    %39 = vector.broadcast %c14_i32 : i32 to vector<1x256xi32>
    %40 = arith.cmpi slt, %3, %39 : vector<1x256xi32>
    %cst_21 = arith.constant 0.000000e+00 : f32
    %41 = vector.broadcast %cst_21 : f32 to vector<1x256xf32>
    %42 = arith.select %40, %37, %41 : vector<1x256xi1>, vector<1x256xf32>
    %cst_22 = arith.constant 0.000000e+00 : f32
    %43 = vector.broadcast %cst_22 : f32 to vector<1x256xf32>
    %44 = arith.select %40, %38, %43 : vector<1x256xi1>, vector<1x256xf32>
    %c253_i32 = arith.constant 253 : i32
    %45 = tpu.dynamic_rotate %1 by %c253_i32 dim 1 : vector<1x256xf32>, i32 -> vector<1x256xf32>
    %c253_i32_23 = arith.constant 253 : i32
    %46 = tpu.dynamic_rotate %2 by %c253_i32_23 dim 1 : vector<1x256xf32>, i32 -> vector<1x256xf32>
    %c13_i32 = arith.constant 13 : i32
    %47 = vector.broadcast %c13_i32 : i32 to vector<1x256xi32>
    %48 = arith.cmpi slt, %3, %47 : vector<1x256xi32>
    %cst_24 = arith.constant 0.000000e+00 : f32
    %49 = vector.broadcast %cst_24 : f32 to vector<1x256xf32>
    %50 = arith.select %48, %45, %49 : vector<1x256xi1>, vector<1x256xf32>
    %cst_25 = arith.constant 0.000000e+00 : f32
    %51 = vector.broadcast %cst_25 : f32 to vector<1x256xf32>
    %52 = arith.select %48, %46, %51 : vector<1x256xi1>, vector<1x256xf32>
    %cst_26 = arith.constant 0.000000e+00 : f32
    %53 = vector.broadcast %cst_26 : f32 to vector<1x256xf32>
    %c0_27 = arith.constant 0 : index
    %54 = memref.load %arg4[%c0_27] : memref<98xf32, #tpu.memory_space<smem>>
    %55 = vector.broadcast %54 : f32 to vector<1x256xf32>
    %56 = arith.mulf %55, %10 : vector<1x256xf32>
    %c49 = arith.constant 49 : index
    %57 = memref.load %arg4[%c49] : memref<98xf32, #tpu.memory_space<smem>>
    %58 = vector.broadcast %57 : f32 to vector<1x256xf32>
    %59 = arith.mulf %58, %12 : vector<1x256xf32>
    %60 = arith.addf %56, %59 : vector<1x256xf32>
    %c1 = arith.constant 1 : index
    %61 = memref.load %arg4[%c1] : memref<98xf32, #tpu.memory_space<smem>>
    %62 = vector.broadcast %61 : f32 to vector<1x256xf32>
    %63 = arith.mulf %62, %18 : vector<1x256xf32>
    %c50 = arith.constant 50 : index
    %64 = memref.load %arg4[%c50] : memref<98xf32, #tpu.memory_space<smem>>
    %65 = vector.broadcast %64 : f32 to vector<1x256xf32>
    %66 = arith.mulf %65, %20 : vector<1x256xf32>
    %67 = arith.addf %63, %66 : vector<1x256xf32>
    %68 = arith.addf %60, %67 : vector<1x256xf32>
    %c2 = arith.constant 2 : index
    %69 = memref.load %arg4[%c2] : memref<98xf32, #tpu.memory_space<smem>>
    %70 = vector.broadcast %69 : f32 to vector<1x256xf32>
    %71 = arith.mulf %70, %26 : vector<1x256xf32>
    %c51 = arith.constant 51 : index
    %72 = memref.load %arg4[%c51] : memref<98xf32, #tpu.memory_space<smem>>
    %73 = vector.broadcast %72 : f32 to vector<1x256xf32>
    %74 = arith.mulf %73, %28 : vector<1x256xf32>
    %75 = arith.addf %71, %74 : vector<1x256xf32>
    %76 = arith.addf %68, %75 : vector<1x256xf32>
    %c3 = arith.constant 3 : index
    %77 = memref.load %arg4[%c3] : memref<98xf32, #tpu.memory_space<smem>>
    %78 = vector.broadcast %77 : f32 to vector<1x256xf32>
    %79 = arith.mulf %78, %1 : vector<1x256xf32>
    %c52 = arith.constant 52 : index
    %80 = memref.load %arg4[%c52] : memref<98xf32, #tpu.memory_space<smem>>
    %81 = vector.broadcast %80 : f32 to vector<1x256xf32>
    %82 = arith.mulf %81, %2 : vector<1x256xf32>
    %83 = arith.addf %79, %82 : vector<1x256xf32>
    %84 = arith.addf %76, %83 : vector<1x256xf32>
    %c4 = arith.constant 4 : index
    %85 = memref.load %arg4[%c4] : memref<98xf32, #tpu.memory_space<smem>>
    %86 = vector.broadcast %85 : f32 to vector<1x256xf32>
    %87 = arith.mulf %86, %34 : vector<1x256xf32>
    %c53 = arith.constant 53 : index
    %88 = memref.load %arg4[%c53] : memref<98xf32, #tpu.memory_space<smem>>
    %89 = vector.broadcast %88 : f32 to vector<1x256xf32>
    %90 = arith.mulf %89, %36 : vector<1x256xf32>
    %91 = arith.addf %87, %90 : vector<1x256xf32>
    %92 = arith.addf %84, %91 : vector<1x256xf32>
    %c5 = arith.constant 5 : index
    %93 = memref.load %arg4[%c5] : memref<98xf32, #tpu.memory_space<smem>>
    %94 = vector.broadcast %93 : f32 to vector<1x256xf32>
    %95 = arith.mulf %94, %42 : vector<1x256xf32>
    %c54 = arith.constant 54 : index
    %96 = memref.load %arg4[%c54] : memref<98xf32, #tpu.memory_space<smem>>
    %97 = vector.broadcast %96 : f32 to vector<1x256xf32>
    %98 = arith.mulf %97, %44 : vector<1x256xf32>
    %99 = arith.addf %95, %98 : vector<1x256xf32>
    %100 = arith.addf %92, %99 : vector<1x256xf32>
    %c6 = arith.constant 6 : index
    %101 = memref.load %arg4[%c6] : memref<98xf32, #tpu.memory_space<smem>>
    %102 = vector.broadcast %101 : f32 to vector<1x256xf32>
    %103 = arith.mulf %102, %50 : vector<1x256xf32>
    %c55 = arith.constant 55 : index
    %104 = memref.load %arg4[%c55] : memref<98xf32, #tpu.memory_space<smem>>
    %105 = vector.broadcast %104 : f32 to vector<1x256xf32>
    %106 = arith.mulf %105, %52 : vector<1x256xf32>
    %107 = arith.addf %103, %106 : vector<1x256xf32>
    %108 = arith.addf %100, %107 : vector<1x256xf32>
    %c48_i32 = arith.constant 48 : i32
    %109 = tpu.dynamic_rotate %108 by %c48_i32 dim 1 : vector<1x256xf32>, i32 -> vector<1x256xf32>
    %c48_i32_28 = arith.constant 48 : i32
    %110 = vector.broadcast %c48_i32_28 : i32 to vector<1x256xi32>
    %111 = arith.cmpi sge, %4, %110 : vector<1x256xi32>
    %cst_29 = arith.constant 0.000000e+00 : f32
    %112 = vector.broadcast %cst_29 : f32 to vector<1x256xf32>
    %113 = arith.select %111, %109, %112 : vector<1x256xi1>, vector<1x256xf32>
    %114 = arith.addf %53, %113 : vector<1x256xf32>
    %c7 = arith.constant 7 : index
    %115 = memref.load %arg4[%c7] : memref<98xf32, #tpu.memory_space<smem>>
    %116 = vector.broadcast %115 : f32 to vector<1x256xf32>
    %117 = arith.mulf %116, %10 : vector<1x256xf32>
    %c56 = arith.constant 56 : index
    %118 = memref.load %arg4[%c56] : memref<98xf32, #tpu.memory_space<smem>>
    %119 = vector.broadcast %118 : f32 to vector<1x256xf32>
    %120 = arith.mulf %119, %12 : vector<1x256xf32>
    %121 = arith.addf %117, %120 : vector<1x256xf32>
    %c8 = arith.constant 8 : index
    %122 = memref.load %arg4[%c8] : memref<98xf32, #tpu.memory_space<smem>>
    %123 = vector.broadcast %122 : f32 to vector<1x256xf32>
    %124 = arith.mulf %123, %18 : vector<1x256xf32>
    %c57 = arith.constant 57 : index
    %125 = memref.load %arg4[%c57] : memref<98xf32, #tpu.memory_space<smem>>
    %126 = vector.broadcast %125 : f32 to vector<1x256xf32>
    %127 = arith.mulf %126, %20 : vector<1x256xf32>
    %128 = arith.addf %124, %127 : vector<1x256xf32>
    %129 = arith.addf %121, %128 : vector<1x256xf32>
    %c9 = arith.constant 9 : index
    %130 = memref.load %arg4[%c9] : memref<98xf32, #tpu.memory_space<smem>>
    %131 = vector.broadcast %130 : f32 to vector<1x256xf32>
    %132 = arith.mulf %131, %26 : vector<1x256xf32>
    %c58 = arith.constant 58 : index
    %133 = memref.load %arg4[%c58] : memref<98xf32, #tpu.memory_space<smem>>
    %134 = vector.broadcast %133 : f32 to vector<1x256xf32>
    %135 = arith.mulf %134, %28 : vector<1x256xf32>
    %136 = arith.addf %132, %135 : vector<1x256xf32>
    %137 = arith.addf %129, %136 : vector<1x256xf32>
    %c10 = arith.constant 10 : index
    %138 = memref.load %arg4[%c10] : memref<98xf32, #tpu.memory_space<smem>>
    %139 = vector.broadcast %138 : f32 to vector<1x256xf32>
    %140 = arith.mulf %139, %1 : vector<1x256xf32>
    %c59 = arith.constant 59 : index
    %141 = memref.load %arg4[%c59] : memref<98xf32, #tpu.memory_space<smem>>
    %142 = vector.broadcast %141 : f32 to vector<1x256xf32>
    %143 = arith.mulf %142, %2 : vector<1x256xf32>
    %144 = arith.addf %140, %143 : vector<1x256xf32>
    %145 = arith.addf %137, %144 : vector<1x256xf32>
    %c11 = arith.constant 11 : index
    %146 = memref.load %arg4[%c11] : memref<98xf32, #tpu.memory_space<smem>>
    %147 = vector.broadcast %146 : f32 to vector<1x256xf32>
    %148 = arith.mulf %147, %34 : vector<1x256xf32>
    %c60 = arith.constant 60 : index
    %149 = memref.load %arg4[%c60] : memref<98xf32, #tpu.memory_space<smem>>
    %150 = vector.broadcast %149 : f32 to vector<1x256xf32>
    %151 = arith.mulf %150, %36 : vector<1x256xf32>
    %152 = arith.addf %148, %151 : vector<1x256xf32>
    %153 = arith.addf %145, %152 : vector<1x256xf32>
    %c12 = arith.constant 12 : index
    %154 = memref.load %arg4[%c12] : memref<98xf32, #tpu.memory_space<smem>>
    %155 = vector.broadcast %154 : f32 to vector<1x256xf32>
    %156 = arith.mulf %155, %42 : vector<1x256xf32>
    %c61 = arith.constant 61 : index
    %157 = memref.load %arg4[%c61] : memref<98xf32, #tpu.memory_space<smem>>
    %158 = vector.broadcast %157 : f32 to vector<1x256xf32>
    %159 = arith.mulf %158, %44 : vector<1x256xf32>
    %160 = arith.addf %156, %159 : vector<1x256xf32>
    %161 = arith.addf %153, %160 : vector<1x256xf32>
    %c13 = arith.constant 13 : index
    %162 = memref.load %arg4[%c13] : memref<98xf32, #tpu.memory_space<smem>>
    %163 = vector.broadcast %162 : f32 to vector<1x256xf32>
    %164 = arith.mulf %163, %50 : vector<1x256xf32>
    %c62 = arith.constant 62 : index
    %165 = memref.load %arg4[%c62] : memref<98xf32, #tpu.memory_space<smem>>
    %166 = vector.broadcast %165 : f32 to vector<1x256xf32>
    %167 = arith.mulf %166, %52 : vector<1x256xf32>
    %168 = arith.addf %164, %167 : vector<1x256xf32>
    %169 = arith.addf %161, %168 : vector<1x256xf32>
    %c32_i32 = arith.constant 32 : i32
    %170 = tpu.dynamic_rotate %169 by %c32_i32 dim 1 : vector<1x256xf32>, i32 -> vector<1x256xf32>
    %c32_i32_30 = arith.constant 32 : i32
    %171 = vector.broadcast %c32_i32_30 : i32 to vector<1x256xi32>
    %172 = arith.cmpi sge, %4, %171 : vector<1x256xi32>
    %cst_31 = arith.constant 0.000000e+00 : f32
    %173 = vector.broadcast %cst_31 : f32 to vector<1x256xf32>
    %174 = arith.select %172, %170, %173 : vector<1x256xi1>, vector<1x256xf32>
    %175 = arith.addf %114, %174 : vector<1x256xf32>
    %c14 = arith.constant 14 : index
    %176 = memref.load %arg4[%c14] : memref<98xf32, #tpu.memory_space<smem>>
    %177 = vector.broadcast %176 : f32 to vector<1x256xf32>
    %178 = arith.mulf %177, %10 : vector<1x256xf32>
    %c63 = arith.constant 63 : index
    %179 = memref.load %arg4[%c63] : memref<98xf32, #tpu.memory_space<smem>>
    %180 = vector.broadcast %179 : f32 to vector<1x256xf32>
    %181 = arith.mulf %180, %12 : vector<1x256xf32>
    %182 = arith.addf %178, %181 : vector<1x256xf32>
    %c15 = arith.constant 15 : index
    %183 = memref.load %arg4[%c15] : memref<98xf32, #tpu.memory_space<smem>>
    %184 = vector.broadcast %183 : f32 to vector<1x256xf32>
    %185 = arith.mulf %184, %18 : vector<1x256xf32>
    %c64 = arith.constant 64 : index
    %186 = memref.load %arg4[%c64] : memref<98xf32, #tpu.memory_space<smem>>
    %187 = vector.broadcast %186 : f32 to vector<1x256xf32>
    %188 = arith.mulf %187, %20 : vector<1x256xf32>
    %189 = arith.addf %185, %188 : vector<1x256xf32>
    %190 = arith.addf %182, %189 : vector<1x256xf32>
    %c16 = arith.constant 16 : index
    %191 = memref.load %arg4[%c16] : memref<98xf32, #tpu.memory_space<smem>>
    %192 = vector.broadcast %191 : f32 to vector<1x256xf32>
    %193 = arith.mulf %192, %26 : vector<1x256xf32>
    %c65 = arith.constant 65 : index
    %194 = memref.load %arg4[%c65] : memref<98xf32, #tpu.memory_space<smem>>
    %195 = vector.broadcast %194 : f32 to vector<1x256xf32>
    %196 = arith.mulf %195, %28 : vector<1x256xf32>
    %197 = arith.addf %193, %196 : vector<1x256xf32>
    %198 = arith.addf %190, %197 : vector<1x256xf32>
    %c17 = arith.constant 17 : index
    %199 = memref.load %arg4[%c17] : memref<98xf32, #tpu.memory_space<smem>>
    %200 = vector.broadcast %199 : f32 to vector<1x256xf32>
    %201 = arith.mulf %200, %1 : vector<1x256xf32>
    %c66 = arith.constant 66 : index
    %202 = memref.load %arg4[%c66] : memref<98xf32, #tpu.memory_space<smem>>
    %203 = vector.broadcast %202 : f32 to vector<1x256xf32>
    %204 = arith.mulf %203, %2 : vector<1x256xf32>
    %205 = arith.addf %201, %204 : vector<1x256xf32>
    %206 = arith.addf %198, %205 : vector<1x256xf32>
    %c18 = arith.constant 18 : index
    %207 = memref.load %arg4[%c18] : memref<98xf32, #tpu.memory_space<smem>>
    %208 = vector.broadcast %207 : f32 to vector<1x256xf32>
    %209 = arith.mulf %208, %34 : vector<1x256xf32>
    %c67 = arith.constant 67 : index
    %210 = memref.load %arg4[%c67] : memref<98xf32, #tpu.memory_space<smem>>
    %211 = vector.broadcast %210 : f32 to vector<1x256xf32>
    %212 = arith.mulf %211, %36 : vector<1x256xf32>
    %213 = arith.addf %209, %212 : vector<1x256xf32>
    %214 = arith.addf %206, %213 : vector<1x256xf32>
    %c19 = arith.constant 19 : index
    %215 = memref.load %arg4[%c19] : memref<98xf32, #tpu.memory_space<smem>>
    %216 = vector.broadcast %215 : f32 to vector<1x256xf32>
    %217 = arith.mulf %216, %42 : vector<1x256xf32>
    %c68 = arith.constant 68 : index
    %218 = memref.load %arg4[%c68] : memref<98xf32, #tpu.memory_space<smem>>
    %219 = vector.broadcast %218 : f32 to vector<1x256xf32>
    %220 = arith.mulf %219, %44 : vector<1x256xf32>
    %221 = arith.addf %217, %220 : vector<1x256xf32>
    %222 = arith.addf %214, %221 : vector<1x256xf32>
    %c20 = arith.constant 20 : index
    %223 = memref.load %arg4[%c20] : memref<98xf32, #tpu.memory_space<smem>>
    %224 = vector.broadcast %223 : f32 to vector<1x256xf32>
    %225 = arith.mulf %224, %50 : vector<1x256xf32>
    %c69 = arith.constant 69 : index
    %226 = memref.load %arg4[%c69] : memref<98xf32, #tpu.memory_space<smem>>
    %227 = vector.broadcast %226 : f32 to vector<1x256xf32>
    %228 = arith.mulf %227, %52 : vector<1x256xf32>
    %229 = arith.addf %225, %228 : vector<1x256xf32>
    %230 = arith.addf %222, %229 : vector<1x256xf32>
    %c16_i32 = arith.constant 16 : i32
    %231 = tpu.dynamic_rotate %230 by %c16_i32 dim 1 : vector<1x256xf32>, i32 -> vector<1x256xf32>
    %c16_i32_32 = arith.constant 16 : i32
    %232 = vector.broadcast %c16_i32_32 : i32 to vector<1x256xi32>
    %233 = arith.cmpi sge, %4, %232 : vector<1x256xi32>
    %cst_33 = arith.constant 0.000000e+00 : f32
    %234 = vector.broadcast %cst_33 : f32 to vector<1x256xf32>
    %235 = arith.select %233, %231, %234 : vector<1x256xi1>, vector<1x256xf32>
    %236 = arith.addf %175, %235 : vector<1x256xf32>
    %c21 = arith.constant 21 : index
    %237 = memref.load %arg4[%c21] : memref<98xf32, #tpu.memory_space<smem>>
    %238 = vector.broadcast %237 : f32 to vector<1x256xf32>
    %239 = arith.mulf %238, %10 : vector<1x256xf32>
    %c70 = arith.constant 70 : index
    %240 = memref.load %arg4[%c70] : memref<98xf32, #tpu.memory_space<smem>>
    %241 = vector.broadcast %240 : f32 to vector<1x256xf32>
    %242 = arith.mulf %241, %12 : vector<1x256xf32>
    %243 = arith.addf %239, %242 : vector<1x256xf32>
    %c22 = arith.constant 22 : index
    %244 = memref.load %arg4[%c22] : memref<98xf32, #tpu.memory_space<smem>>
    %245 = vector.broadcast %244 : f32 to vector<1x256xf32>
    %246 = arith.mulf %245, %18 : vector<1x256xf32>
    %c71 = arith.constant 71 : index
    %247 = memref.load %arg4[%c71] : memref<98xf32, #tpu.memory_space<smem>>
    %248 = vector.broadcast %247 : f32 to vector<1x256xf32>
    %249 = arith.mulf %248, %20 : vector<1x256xf32>
    %250 = arith.addf %246, %249 : vector<1x256xf32>
    %251 = arith.addf %243, %250 : vector<1x256xf32>
    %c23 = arith.constant 23 : index
    %252 = memref.load %arg4[%c23] : memref<98xf32, #tpu.memory_space<smem>>
    %253 = vector.broadcast %252 : f32 to vector<1x256xf32>
    %254 = arith.mulf %253, %26 : vector<1x256xf32>
    %c72 = arith.constant 72 : index
    %255 = memref.load %arg4[%c72] : memref<98xf32, #tpu.memory_space<smem>>
    %256 = vector.broadcast %255 : f32 to vector<1x256xf32>
    %257 = arith.mulf %256, %28 : vector<1x256xf32>
    %258 = arith.addf %254, %257 : vector<1x256xf32>
    %259 = arith.addf %251, %258 : vector<1x256xf32>
    %c24 = arith.constant 24 : index
    %260 = memref.load %arg4[%c24] : memref<98xf32, #tpu.memory_space<smem>>
    %261 = vector.broadcast %260 : f32 to vector<1x256xf32>
    %262 = arith.mulf %261, %1 : vector<1x256xf32>
    %c73 = arith.constant 73 : index
    %263 = memref.load %arg4[%c73] : memref<98xf32, #tpu.memory_space<smem>>
    %264 = vector.broadcast %263 : f32 to vector<1x256xf32>
    %265 = arith.mulf %264, %2 : vector<1x256xf32>
    %266 = arith.addf %262, %265 : vector<1x256xf32>
    %267 = arith.addf %259, %266 : vector<1x256xf32>
    %c25 = arith.constant 25 : index
    %268 = memref.load %arg4[%c25] : memref<98xf32, #tpu.memory_space<smem>>
    %269 = vector.broadcast %268 : f32 to vector<1x256xf32>
    %270 = arith.mulf %269, %34 : vector<1x256xf32>
    %c74 = arith.constant 74 : index
    %271 = memref.load %arg4[%c74] : memref<98xf32, #tpu.memory_space<smem>>
    %272 = vector.broadcast %271 : f32 to vector<1x256xf32>
    %273 = arith.mulf %272, %36 : vector<1x256xf32>
    %274 = arith.addf %270, %273 : vector<1x256xf32>
    %275 = arith.addf %267, %274 : vector<1x256xf32>
    %c26 = arith.constant 26 : index
    %276 = memref.load %arg4[%c26] : memref<98xf32, #tpu.memory_space<smem>>
    %277 = vector.broadcast %276 : f32 to vector<1x256xf32>
    %278 = arith.mulf %277, %42 : vector<1x256xf32>
    %c75 = arith.constant 75 : index
    %279 = memref.load %arg4[%c75] : memref<98xf32, #tpu.memory_space<smem>>
    %280 = vector.broadcast %279 : f32 to vector<1x256xf32>
    %281 = arith.mulf %280, %44 : vector<1x256xf32>
    %282 = arith.addf %278, %281 : vector<1x256xf32>
    %283 = arith.addf %275, %282 : vector<1x256xf32>
    %c27 = arith.constant 27 : index
    %284 = memref.load %arg4[%c27] : memref<98xf32, #tpu.memory_space<smem>>
    %285 = vector.broadcast %284 : f32 to vector<1x256xf32>
    %286 = arith.mulf %285, %50 : vector<1x256xf32>
    %c76 = arith.constant 76 : index
    %287 = memref.load %arg4[%c76] : memref<98xf32, #tpu.memory_space<smem>>
    %288 = vector.broadcast %287 : f32 to vector<1x256xf32>
    %289 = arith.mulf %288, %52 : vector<1x256xf32>
    %290 = arith.addf %286, %289 : vector<1x256xf32>
    %291 = arith.addf %283, %290 : vector<1x256xf32>
    %292 = arith.addf %236, %291 : vector<1x256xf32>
    %c28 = arith.constant 28 : index
    %293 = memref.load %arg4[%c28] : memref<98xf32, #tpu.memory_space<smem>>
    %294 = vector.broadcast %293 : f32 to vector<1x256xf32>
    %295 = arith.mulf %294, %10 : vector<1x256xf32>
    %c77 = arith.constant 77 : index
    %296 = memref.load %arg4[%c77] : memref<98xf32, #tpu.memory_space<smem>>
    %297 = vector.broadcast %296 : f32 to vector<1x256xf32>
    %298 = arith.mulf %297, %12 : vector<1x256xf32>
    %299 = arith.addf %295, %298 : vector<1x256xf32>
    %c29 = arith.constant 29 : index
    %300 = memref.load %arg4[%c29] : memref<98xf32, #tpu.memory_space<smem>>
    %301 = vector.broadcast %300 : f32 to vector<1x256xf32>
    %302 = arith.mulf %301, %18 : vector<1x256xf32>
    %c78 = arith.constant 78 : index
    %303 = memref.load %arg4[%c78] : memref<98xf32, #tpu.memory_space<smem>>
    %304 = vector.broadcast %303 : f32 to vector<1x256xf32>
    %305 = arith.mulf %304, %20 : vector<1x256xf32>
    %306 = arith.addf %302, %305 : vector<1x256xf32>
    %307 = arith.addf %299, %306 : vector<1x256xf32>
    %c30 = arith.constant 30 : index
    %308 = memref.load %arg4[%c30] : memref<98xf32, #tpu.memory_space<smem>>
    %309 = vector.broadcast %308 : f32 to vector<1x256xf32>
    %310 = arith.mulf %309, %26 : vector<1x256xf32>
    %c79 = arith.constant 79 : index
    %311 = memref.load %arg4[%c79] : memref<98xf32, #tpu.memory_space<smem>>
    %312 = vector.broadcast %311 : f32 to vector<1x256xf32>
    %313 = arith.mulf %312, %28 : vector<1x256xf32>
    %314 = arith.addf %310, %313 : vector<1x256xf32>
    %315 = arith.addf %307, %314 : vector<1x256xf32>
    %c31 = arith.constant 31 : index
    %316 = memref.load %arg4[%c31] : memref<98xf32, #tpu.memory_space<smem>>
    %317 = vector.broadcast %316 : f32 to vector<1x256xf32>
    %318 = arith.mulf %317, %1 : vector<1x256xf32>
    %c80 = arith.constant 80 : index
    %319 = memref.load %arg4[%c80] : memref<98xf32, #tpu.memory_space<smem>>
    %320 = vector.broadcast %319 : f32 to vector<1x256xf32>
    %321 = arith.mulf %320, %2 : vector<1x256xf32>
    %322 = arith.addf %318, %321 : vector<1x256xf32>
    %323 = arith.addf %315, %322 : vector<1x256xf32>
    %c32 = arith.constant 32 : index
    %324 = memref.load %arg4[%c32] : memref<98xf32, #tpu.memory_space<smem>>
    %325 = vector.broadcast %324 : f32 to vector<1x256xf32>
    %326 = arith.mulf %325, %34 : vector<1x256xf32>
    %c81 = arith.constant 81 : index
    %327 = memref.load %arg4[%c81] : memref<98xf32, #tpu.memory_space<smem>>
    %328 = vector.broadcast %327 : f32 to vector<1x256xf32>
    %329 = arith.mulf %328, %36 : vector<1x256xf32>
    %330 = arith.addf %326, %329 : vector<1x256xf32>
    %331 = arith.addf %323, %330 : vector<1x256xf32>
    %c33 = arith.constant 33 : index
    %332 = memref.load %arg4[%c33] : memref<98xf32, #tpu.memory_space<smem>>
    %333 = vector.broadcast %332 : f32 to vector<1x256xf32>
    %334 = arith.mulf %333, %42 : vector<1x256xf32>
    %c82 = arith.constant 82 : index
    %335 = memref.load %arg4[%c82] : memref<98xf32, #tpu.memory_space<smem>>
    %336 = vector.broadcast %335 : f32 to vector<1x256xf32>
    %337 = arith.mulf %336, %44 : vector<1x256xf32>
    %338 = arith.addf %334, %337 : vector<1x256xf32>
    %339 = arith.addf %331, %338 : vector<1x256xf32>
    %c34 = arith.constant 34 : index
    %340 = memref.load %arg4[%c34] : memref<98xf32, #tpu.memory_space<smem>>
    %341 = vector.broadcast %340 : f32 to vector<1x256xf32>
    %342 = arith.mulf %341, %50 : vector<1x256xf32>
    %c83 = arith.constant 83 : index
    %343 = memref.load %arg4[%c83] : memref<98xf32, #tpu.memory_space<smem>>
    %344 = vector.broadcast %343 : f32 to vector<1x256xf32>
    %345 = arith.mulf %344, %52 : vector<1x256xf32>
    %346 = arith.addf %342, %345 : vector<1x256xf32>
    %347 = arith.addf %339, %346 : vector<1x256xf32>
    %c240_i32 = arith.constant 240 : i32
    %348 = tpu.dynamic_rotate %347 by %c240_i32 dim 1 : vector<1x256xf32>, i32 -> vector<1x256xf32>
    %c240_i32_34 = arith.constant 240 : i32
    %349 = vector.broadcast %c240_i32_34 : i32 to vector<1x256xi32>
    %350 = arith.cmpi slt, %4, %349 : vector<1x256xi32>
    %cst_35 = arith.constant 0.000000e+00 : f32
    %351 = vector.broadcast %cst_35 : f32 to vector<1x256xf32>
    %352 = arith.select %350, %348, %351 : vector<1x256xi1>, vector<1x256xf32>
    %353 = arith.addf %292, %352 : vector<1x256xf32>
    %c35 = arith.constant 35 : index
    %354 = memref.load %arg4[%c35] : memref<98xf32, #tpu.memory_space<smem>>
    %355 = vector.broadcast %354 : f32 to vector<1x256xf32>
    %356 = arith.mulf %355, %10 : vector<1x256xf32>
    %c84 = arith.constant 84 : index
    %357 = memref.load %arg4[%c84] : memref<98xf32, #tpu.memory_space<smem>>
    %358 = vector.broadcast %357 : f32 to vector<1x256xf32>
    %359 = arith.mulf %358, %12 : vector<1x256xf32>
    %360 = arith.addf %356, %359 : vector<1x256xf32>
    %c36 = arith.constant 36 : index
    %361 = memref.load %arg4[%c36] : memref<98xf32, #tpu.memory_space<smem>>
    %362 = vector.broadcast %361 : f32 to vector<1x256xf32>
    %363 = arith.mulf %362, %18 : vector<1x256xf32>
    %c85 = arith.constant 85 : index
    %364 = memref.load %arg4[%c85] : memref<98xf32, #tpu.memory_space<smem>>
    %365 = vector.broadcast %364 : f32 to vector<1x256xf32>
    %366 = arith.mulf %365, %20 : vector<1x256xf32>
    %367 = arith.addf %363, %366 : vector<1x256xf32>
    %368 = arith.addf %360, %367 : vector<1x256xf32>
    %c37 = arith.constant 37 : index
    %369 = memref.load %arg4[%c37] : memref<98xf32, #tpu.memory_space<smem>>
    %370 = vector.broadcast %369 : f32 to vector<1x256xf32>
    %371 = arith.mulf %370, %26 : vector<1x256xf32>
    %c86 = arith.constant 86 : index
    %372 = memref.load %arg4[%c86] : memref<98xf32, #tpu.memory_space<smem>>
    %373 = vector.broadcast %372 : f32 to vector<1x256xf32>
    %374 = arith.mulf %373, %28 : vector<1x256xf32>
    %375 = arith.addf %371, %374 : vector<1x256xf32>
    %376 = arith.addf %368, %375 : vector<1x256xf32>
    %c38 = arith.constant 38 : index
    %377 = memref.load %arg4[%c38] : memref<98xf32, #tpu.memory_space<smem>>
    %378 = vector.broadcast %377 : f32 to vector<1x256xf32>
    %379 = arith.mulf %378, %1 : vector<1x256xf32>
    %c87 = arith.constant 87 : index
    %380 = memref.load %arg4[%c87] : memref<98xf32, #tpu.memory_space<smem>>
    %381 = vector.broadcast %380 : f32 to vector<1x256xf32>
    %382 = arith.mulf %381, %2 : vector<1x256xf32>
    %383 = arith.addf %379, %382 : vector<1x256xf32>
    %384 = arith.addf %376, %383 : vector<1x256xf32>
    %c39 = arith.constant 39 : index
    %385 = memref.load %arg4[%c39] : memref<98xf32, #tpu.memory_space<smem>>
    %386 = vector.broadcast %385 : f32 to vector<1x256xf32>
    %387 = arith.mulf %386, %34 : vector<1x256xf32>
    %c88 = arith.constant 88 : index
    %388 = memref.load %arg4[%c88] : memref<98xf32, #tpu.memory_space<smem>>
    %389 = vector.broadcast %388 : f32 to vector<1x256xf32>
    %390 = arith.mulf %389, %36 : vector<1x256xf32>
    %391 = arith.addf %387, %390 : vector<1x256xf32>
    %392 = arith.addf %384, %391 : vector<1x256xf32>
    %c40 = arith.constant 40 : index
    %393 = memref.load %arg4[%c40] : memref<98xf32, #tpu.memory_space<smem>>
    %394 = vector.broadcast %393 : f32 to vector<1x256xf32>
    %395 = arith.mulf %394, %42 : vector<1x256xf32>
    %c89 = arith.constant 89 : index
    %396 = memref.load %arg4[%c89] : memref<98xf32, #tpu.memory_space<smem>>
    %397 = vector.broadcast %396 : f32 to vector<1x256xf32>
    %398 = arith.mulf %397, %44 : vector<1x256xf32>
    %399 = arith.addf %395, %398 : vector<1x256xf32>
    %400 = arith.addf %392, %399 : vector<1x256xf32>
    %c41 = arith.constant 41 : index
    %401 = memref.load %arg4[%c41] : memref<98xf32, #tpu.memory_space<smem>>
    %402 = vector.broadcast %401 : f32 to vector<1x256xf32>
    %403 = arith.mulf %402, %50 : vector<1x256xf32>
    %c90 = arith.constant 90 : index
    %404 = memref.load %arg4[%c90] : memref<98xf32, #tpu.memory_space<smem>>
    %405 = vector.broadcast %404 : f32 to vector<1x256xf32>
    %406 = arith.mulf %405, %52 : vector<1x256xf32>
    %407 = arith.addf %403, %406 : vector<1x256xf32>
    %408 = arith.addf %400, %407 : vector<1x256xf32>
    %c224_i32 = arith.constant 224 : i32
    %409 = tpu.dynamic_rotate %408 by %c224_i32 dim 1 : vector<1x256xf32>, i32 -> vector<1x256xf32>
    %c224_i32_36 = arith.constant 224 : i32
    %410 = vector.broadcast %c224_i32_36 : i32 to vector<1x256xi32>
    %411 = arith.cmpi slt, %4, %410 : vector<1x256xi32>
    %cst_37 = arith.constant 0.000000e+00 : f32
    %412 = vector.broadcast %cst_37 : f32 to vector<1x256xf32>
    %413 = arith.select %411, %409, %412 : vector<1x256xi1>, vector<1x256xf32>
    %414 = arith.addf %353, %413 : vector<1x256xf32>
    %c42 = arith.constant 42 : index
    %415 = memref.load %arg4[%c42] : memref<98xf32, #tpu.memory_space<smem>>
    %416 = vector.broadcast %415 : f32 to vector<1x256xf32>
    %417 = arith.mulf %416, %10 : vector<1x256xf32>
    %c91 = arith.constant 91 : index
    %418 = memref.load %arg4[%c91] : memref<98xf32, #tpu.memory_space<smem>>
    %419 = vector.broadcast %418 : f32 to vector<1x256xf32>
    %420 = arith.mulf %419, %12 : vector<1x256xf32>
    %421 = arith.addf %417, %420 : vector<1x256xf32>
    %c43 = arith.constant 43 : index
    %422 = memref.load %arg4[%c43] : memref<98xf32, #tpu.memory_space<smem>>
    %423 = vector.broadcast %422 : f32 to vector<1x256xf32>
    %424 = arith.mulf %423, %18 : vector<1x256xf32>
    %c92 = arith.constant 92 : index
    %425 = memref.load %arg4[%c92] : memref<98xf32, #tpu.memory_space<smem>>
    %426 = vector.broadcast %425 : f32 to vector<1x256xf32>
    %427 = arith.mulf %426, %20 : vector<1x256xf32>
    %428 = arith.addf %424, %427 : vector<1x256xf32>
    %429 = arith.addf %421, %428 : vector<1x256xf32>
    %c44 = arith.constant 44 : index
    %430 = memref.load %arg4[%c44] : memref<98xf32, #tpu.memory_space<smem>>
    %431 = vector.broadcast %430 : f32 to vector<1x256xf32>
    %432 = arith.mulf %431, %26 : vector<1x256xf32>
    %c93 = arith.constant 93 : index
    %433 = memref.load %arg4[%c93] : memref<98xf32, #tpu.memory_space<smem>>
    %434 = vector.broadcast %433 : f32 to vector<1x256xf32>
    %435 = arith.mulf %434, %28 : vector<1x256xf32>
    %436 = arith.addf %432, %435 : vector<1x256xf32>
    %437 = arith.addf %429, %436 : vector<1x256xf32>
    %c45 = arith.constant 45 : index
    %438 = memref.load %arg4[%c45] : memref<98xf32, #tpu.memory_space<smem>>
    %439 = vector.broadcast %438 : f32 to vector<1x256xf32>
    %440 = arith.mulf %439, %1 : vector<1x256xf32>
    %c94 = arith.constant 94 : index
    %441 = memref.load %arg4[%c94] : memref<98xf32, #tpu.memory_space<smem>>
    %442 = vector.broadcast %441 : f32 to vector<1x256xf32>
    %443 = arith.mulf %442, %2 : vector<1x256xf32>
    %444 = arith.addf %440, %443 : vector<1x256xf32>
    %445 = arith.addf %437, %444 : vector<1x256xf32>
    %c46 = arith.constant 46 : index
    %446 = memref.load %arg4[%c46] : memref<98xf32, #tpu.memory_space<smem>>
    %447 = vector.broadcast %446 : f32 to vector<1x256xf32>
    %448 = arith.mulf %447, %34 : vector<1x256xf32>
    %c95 = arith.constant 95 : index
    %449 = memref.load %arg4[%c95] : memref<98xf32, #tpu.memory_space<smem>>
    %450 = vector.broadcast %449 : f32 to vector<1x256xf32>
    %451 = arith.mulf %450, %36 : vector<1x256xf32>
    %452 = arith.addf %448, %451 : vector<1x256xf32>
    %453 = arith.addf %445, %452 : vector<1x256xf32>
    %c47 = arith.constant 47 : index
    %454 = memref.load %arg4[%c47] : memref<98xf32, #tpu.memory_space<smem>>
    %455 = vector.broadcast %454 : f32 to vector<1x256xf32>
    %456 = arith.mulf %455, %42 : vector<1x256xf32>
    %c96 = arith.constant 96 : index
    %457 = memref.load %arg4[%c96] : memref<98xf32, #tpu.memory_space<smem>>
    %458 = vector.broadcast %457 : f32 to vector<1x256xf32>
    %459 = arith.mulf %458, %44 : vector<1x256xf32>
    %460 = arith.addf %456, %459 : vector<1x256xf32>
    %461 = arith.addf %453, %460 : vector<1x256xf32>
    %c48 = arith.constant 48 : index
    %462 = memref.load %arg4[%c48] : memref<98xf32, #tpu.memory_space<smem>>
    %463 = vector.broadcast %462 : f32 to vector<1x256xf32>
    %464 = arith.mulf %463, %50 : vector<1x256xf32>
    %c97 = arith.constant 97 : index
    %465 = memref.load %arg4[%c97] : memref<98xf32, #tpu.memory_space<smem>>
    %466 = vector.broadcast %465 : f32 to vector<1x256xf32>
    %467 = arith.mulf %466, %52 : vector<1x256xf32>
    %468 = arith.addf %464, %467 : vector<1x256xf32>
    %469 = arith.addf %461, %468 : vector<1x256xf32>
    %c208_i32 = arith.constant 208 : i32
    %470 = tpu.dynamic_rotate %469 by %c208_i32 dim 1 : vector<1x256xf32>, i32 -> vector<1x256xf32>
    %c208_i32_38 = arith.constant 208 : i32
    %471 = vector.broadcast %c208_i32_38 : i32 to vector<1x256xi32>
    %472 = arith.cmpi slt, %4, %471 : vector<1x256xi32>
    %cst_39 = arith.constant 0.000000e+00 : f32
    %473 = vector.broadcast %cst_39 : f32 to vector<1x256xf32>
    %474 = arith.select %472, %470, %473 : vector<1x256xi1>, vector<1x256xf32>
    %475 = arith.addf %414, %474 : vector<1x256xf32>
    %476 = arith.negf %475 : vector<1x256xf32>
    %477 = math.exp %476 : vector<1x256xf32>
    %cst_40 = arith.constant 1.000000e+00 : f32
    %478 = vector.broadcast %cst_40 : f32 to vector<1x256xf32>
    %479 = arith.addf %478, %477 : vector<1x256xf32>
    %480 = arith.divf %478, %479 : vector<1x256xf32>
    %c0_41 = arith.constant 0 : index
    %c0_42 = arith.constant 0 : index
    %c0_43 = arith.constant 0 : index
    %481 = vector.load %arg5[%c0_41, %c0_42, %c0_43] : memref<1x1x256xf32, #tpu.memory_space<vmem>>, vector<1x1x256xf32>
    %482 = vector.shape_cast %481 : vector<1x1x256xf32> to vector<1x256xf32>
    %483 = vector.shape_cast %480 : vector<1x256xf32> to vector<1x1x256xf32>
    tpu.vector_store %arg5[%c0_41, %c0_42, %c0_43], %483 {strides = array<i32>} : memref<1x1x256xf32, #tpu.memory_space<vmem>>, vector<1x1x256xf32>,
    return
  }
  func.func @transform_0(%arg0: i32, %arg1: i32) -> (i32, i32, i32) {
    %c0_i32 = arith.constant 0 : i32
    %c0_i32_0 = arith.constant 0 : i32
    return %arg0, %arg1, %c0_i32 : i32, i32, i32
  }
  func.func @transform_1(%arg0: i32, %arg1: i32) -> (i32, i32) {
    %c0_i32 = arith.constant 0 : i32
    %c0_i32_0 = arith.constant 0 : i32
    %c0_i32_1 = arith.constant 0 : i32
    return %c0_i32, %c0_i32_0 : i32, i32
  }
  func.func @transform_2(%arg0: i32, %arg1: i32) -> i32 {
    %c0_i32 = arith.constant 0 : i32
    %c0_i32_0 = arith.constant 0 : i32
    return %c0_i32 : i32
  }
  func.func @transform_3(%arg0: i32, %arg1: i32) -> (i32, i32, i32) {
    %c0_i32 = arith.constant 0 : i32
    %c0_i32_0 = arith.constant 0 : i32
    %c0_i32_1 = arith.constant 0 : i32
    return %arg0, %c0_i32, %c0_i32_0 : i32, i32, i32
  }
}

</mosaic_0001>

<bundles_post_ra>
// kernel: spatial_attention.1
= control target key start
LH: loop header
LB: loop body
LE: loop exit
PB: predicated region body
PF: predicated region fallthrough
CT: control target
= control target key end

     0   :  { %s2535_s0 = inlined_call_operand.vmem [shape: f32[2,4,256], index: 0, kind: input, shape index: {}]   ;;  %s2536_s1 = inlined_call_operand.vmem [shape: s32[1,256], index: 1, kind: input, shape index: {}]   ;;  %s2537_s2 = inlined_call_operand.vmem [shape: f32[98], index: 2, kind: input, shape index: {}]   ;;  %s2538_s3 = inlined_call_operand.vmem [shape: f32[2,1,256], index: 3, kind: output, shape index: {}]  }
   0x1   :  { %2606 = sst [smem:[#allocation69_spill]] %s2535_s0 }
   0x2   :  { %2607 = sst [smem:[#allocation70_spill]] %s2536_s1 }
   0x3   :  { %2608 = sst [smem:[#allocation71_spill]] %s2537_s2 }
   0x4   :  { %2609 = sst [smem:[#allocation72_spill]] %s2538_s3 }
   0x5   :  { %8 = vsyncpa [#allocation5], 0  ;;  %s1611_s12 = smov 0   ;;  %s1613_s13 = smov 0  }
   0x6   :  { %s1615_s14 = smov 0  }
   0x7 LB: > { %2610 = sst [smem:[#allocation7_spill]] %s1571_s13  ;;  %s1365_s15 = sadd.s32 4294967295, %s1575_s14   ;;  %s1575_s14 = sphi %s1615_s14, %s14_s14   ;;  %s1571_s13 = sphi %s1613_s13, %s2830_s13   ;;  %s1567_s12 = sphi %s1611_s12, %s2829_s12  }
   0x8   : > { %2611 = sst [smem:[#allocation8_spill]] %s1575_s14  ;;  %s26_s16 = sadd.s32 1, %s1571_s13 }
   0x9   : > { %p28_p0 = scmp.ge.s32.totalorder %s26_s16, 2  ;;  %p1367_p1 = scmp.ge.s32.totalorder %s1575_s14, 1 }
   0xa   : > { %p127_p2 = scmp.lt.s32.totalorder %s1575_s14, 3  ;;  %p1636_p4 = scmp.eq.s32.totalorder %s1365_s15, 0 }
   0xb   : > { %s2832_s16 = smov (%p28_p0, %s26_s16), 0  ;;  %s2615_s2 = sld [smem:[#allocation71_spill]] }
   0xc   : > { %2612 = sst [smem:[#allocation9_spill]] %s2832_s16  ;;  %p1632_p3 = pnand %p1367_p1, %p127_p2 }
   0xe   : > { %p1481_p5 = pneg %p1632_p3 }
  0x10   : > { %p1482_p6 = pnand %p1636_p4, %p1481_p5 }
  0x11   : > { %s143_s21 = sshll.u32 %s2615_s2, 4  ;;  %s144_s21 = int_to_ptr.vmem [resolvable:$true] %s143_s21 }
  0x12   : > { %s1534_s22 = scalar_lea.vmem %s144_s21, 16  ;;  %p1536_p8 = pneg %p1482_p6 }
  0x13   : > { %p1535_p7 = scmp.ne.s32.totalorder %s144_s21, %s1534_s22  ;;  %p1542_p11 = scmp.lt.s32.totalorder %s144_s21, %s144_s21 }
  0x14   : > { %p1543_p12 = scmp.lt.s32.totalorder %s1534_s22, %s1534_s22 }
  0x15   : > { %p1537_p9 = pnand %p1536_p8, %p1535_p7 }
  0x16   : > { %p1544_p13 = por %p1543_p12, %p1542_p11 }
  0x17   : > { %p1538_p10 = pneg %p1537_p9 }
  0x19   : > { %p1545_p0 = pnand %p1544_p13, %p1538_p10 }
  0x1b   : > { %1548 = shalt.err (!%p1545_p0)
}
  0x1c   : > { %s1577_s23 = smov [#allocation4]   ;;  %168 = sbr.rel (%p1632_p3) target bundleno = 443 (0x1bb), region = 32 }
  0x1d   : > { %1484 = dma.vmem_to_smem (!%p1482_p6), %s144_s21, 16, %s1577_s23, [#allocation5]  }
  0x21   : > { %1562 = dma.done.wait (%p1636_p4), [#allocation5], 16  }
  0x22   : > { %1564 = vsyncadd (%p1636_p4), [#allocation5], 4294967280 }
  0x23   : > { %174 = sfence }
  0x24   : > { %p196_p1 = scmp.lt.s32.totalorder %s1567_s12, 1  ;;  %vm213_vm0 = vcmask 1043456   ;;  %s2617_s0 = sld [smem:[#allocation69_spill]]  ;;  %v1584_v32 = vmov 1966171168   ;;  %v2592_v34 = vlaneseq }
  0x25   : > { %s1578_s28 = smov 3   ;;  %s1579_s29 = smov 2   ;;  %v264_v33 = vunpack.c.l.s4 %v1584_v32 }
  0x26   : > { %s2834_s12 = smov (!%p196_p1, %s1567_s12), 1  ;;  %s1580_s30 = smov 1   ;;  %v1818_v42 = vshrl.u32 %v2592_v34, 7  ;;  %v1831_v49 = vand.u32 127, %v2592_v34 }
  0x27   : > { %2616 = sst [smem:[#allocation10_spill]] %s2834_s12  ;;  %s1476_s24 = sshll.u32 %s2834_s12, 3  ;;  %v265_v41 = vunpack.c.0.s8 %v264_v33 }
  0x28   : > { %s1581_s4 = smov 127   ;;  %s1685_s5 = sld [smem:[#allocation4 + $0x46]]  ;;  %vm250_vm1 = vcmp.lt.s32.totalorder %v1831_v49, 3  ;;  %vm302_vm2 = vcmp.lt.s32.totalorder %v1831_v49, 2  ;;  %vm354_vm4 = vcmp.lt.s32.totalorder %v1831_v49, 1  ;;  %vm406_vm7 = vcmp.lt.s32.totalorder %v1831_v49, 127 }
  0x29   : > { %s1687_s6 = sld [smem:[#allocation4 + $0x31]]  ;;  %s1582_s8 = smov 126   ;;  %v1836_v50 = vsub.s32 %v265_v41, %v1818_v42  ;;  %vm458_vm9 = vcmp.lt.s32.totalorder %v1831_v49, 126  ;;  %vm510_vm11 = vcmp.lt.s32.totalorder %v1831_v49, 125  ;;  %vm649_vm13 = vcmp.lt.s32.totalorder %v1831_v49, 48 }
  0x2a   : > { %s204_s27 = scalar_lea.vmem %s2617_s0, %s1476_s24  ;;  %s1689_s7 = sld [smem:[#allocation4 + $0x38]]  ;;  %vm749_vm14 = vcmp.lt.s32.totalorder %v1831_v49, 32  ;;  %vm752_vm15 = vcmp.ge.s32.totalorder %v1831_v49, 32 }
  0x2b   : > { %v209_v0 = vld [vmem:[%s204_s27] sm:$0xff]  ;;  %s1693_s9 = sld [smem:[#allocation4 + $0x3f]]  ;;  %s1583_s21 = smov 125  }
  0x2c   : > { %v228_v1 = vsel %vm213_vm0, %v209_v0, -inf  ;;  %v214_v2 = vsel %vm213_vm0, %v209_v0, 0.0  ;;  %v211_v3 = vcombine.high %v209_v0, %v209_v0  ;;  %s1695_s10 = sld [smem:[#allocation4 + $0x16]] }
  0x2d   : > { %v229_v4 = vrot.slane %v228_v1, 4  ;;  %v215_v5 = vrot.slane %v214_v2, 4  ;;  %s1697_s11 = sld [smem:[#allocation4 + $0x1]] }
  0x2e   : > { %v235_v6 = vsel %vm213_vm0, %v211_v3, -inf  ;;  %v221_v7 = vsel %vm213_vm0, %v211_v3, 0.0  ;;  %2618 = sst [smem:[#allocation11_spill]] %s1685_s5  ;;  %v862_v51 = vstv %s1685_s5  ;;  %vm652_vm0 = vcmp.ge.s32.totalorder %v1831_v49, 48 }
  0x2f   : > { %v230_v8 = vmax.f32 %v228_v1, %v229_v4  ;;  %v216_v9 = vadd.f32 %v215_v5, %v214_v2  ;;  %v236_v10 = vrot.slane %v235_v6, 4  ;;  %v222_v11 = vrot.slane %v221_v7, 4  ;;  %2619 = sst [smem:[#allocation12_spill]] %s1687_s6 }
  0x30   : > { %2620 = sst [smem:[#allocation13_spill]] %s1689_s7  ;;  %v562_v54 = vstv %s1687_s6  ;;  %v662_v55 = vstv %s1689_s7 }
  0x31   : > { %v231_v12 = vrot.slane %v230_v8, 2  ;;  %v217_v13 = vrot.slane %v216_v9, 2  ;;  %v237_v14 = vmax.f32 %v235_v6, %v236_v10  ;;  %v223_v15 = vadd.f32 %v222_v11, %v221_v7  ;;  %2621 = sst [smem:[#allocation14_spill]] %s1693_s9 }
  0x32   : > { %2622 = sst [smem:[#allocation15_spill]] %s1695_s10  ;;  %v866_v58 = vstv %s1695_s10  ;;  %v762_v61 = vstv %s1693_s9 }
  0x33   : > { %v232_v16 = vmax.f32 %v230_v8, %v231_v12  ;;  %v218_v17 = vadd.f32 %v217_v13, %v216_v9  ;;  %v238_v18 = vrot.slane %v237_v14, 2  ;;  %v224_v19 = vrot.slane %v223_v15, 2  ;;  %2623 = sst [smem:[#allocation16_spill]] %s1697_s11 }
  0x34   : > { %s1699_s15 = sld [smem:[#allocation4 + $0x8]]  ;;  %v566_v59 = vstv %s1697_s11 }
  0x35   : > { %v233_v20 = vrot.slane %v232_v16, 1  ;;  %v219_v21 = vrot.slane %v218_v17, 1  ;;  %v239_v22 = vmax.f32 %v237_v14, %v238_v18  ;;  %v225_v23 = vadd.f32 %v224_v19, %v223_v15  ;;  %s1703_s17 = sld [smem:[#allocation4 + $0x47]] }
  0x36   : > { %s1705_s18 = sld [smem:[#allocation4 + $0x32]] }
  0x37   : > { %v1661_v24 = vmax.f32 %v232_v16, %v233_v20  ;;  %v1663_v25 = vadd.f32 %v219_v21, %v218_v17  ;;  %v240_v26 = vrot.slane %v239_v22, 1  ;;  %v226_v28 = vrot.slane %v225_v23, 1  ;;  %s1707_s19 = sld [smem:[#allocation4 + $0x39]] }
  0x38   : > { %s1709_s20 = sld [smem:[#allocation4 + $0xf]] }
  0x39   : > { %253 = vrot.lane.b32.xlu1 %v1661_v24, %s1578_s28  ;;  %246 = vrot.lane.b32.xlu0 %v1663_v25, %s1578_s28  ;;  %v1667_v27 = vmax.f32 %v239_v22, %v240_v26  ;;  %v1671_v29 = vadd.f32 %v226_v28, %v225_v23  ;;  %s1713_s22 = sld [smem:[#allocation4 + $0x40]] }
  0x3a   : > { %2624 = sst [smem:[#allocation17_spill]] %s1699_s15  ;;  %v666_v4 = vstv %s1699_s15 }
  0x3b   : > { %2625 = sst [smem:[#allocation18_spill]] %s1703_s17 }
  0x3c   : > { %2626 = sst [smem:[#allocation19_spill]] %s1705_s18  ;;  %v569_v3 = vstv %s1705_s18 }
  0x3d   : > { %298 = vrot.lane.b32.xlu0 %v1663_v25, %s1579_s29  ;;  %255 = vrot.lane.b32.xlu1 %v1667_v27, %s1578_s28  ;;  %2627 = sst [smem:[#allocation20_spill]] %s1707_s19  ;;  %v669_v5 = vstv %s1707_s19 }
  0x3e   : > { %2628 = sst [smem:[#allocation21_spill]] %s1709_s20  ;;  %v766_v8 = vstv %s1709_s20 }
  0x3f   : > { %2629 = sst [smem:[#allocation22_spill]] %s1713_s22  ;;  %v769_v9 = vstv %s1713_s22 }
  0x40   : > { %s1715_s23 = sld [smem:[#allocation4 + $0x2]] }
  0x41   : > { %305 = vrot.lane.b32.xlu0 %v1661_v24, %s1579_s29  ;;  %300 = vrot.lane.b32.xlu1 %v1671_v29, %s1579_s29  ;;  %s1717_s24 = sld [smem:[#allocation4 + $0x4d]] }
  0x42   : > { %s1719_s25 = sld [smem:[#allocation4 + $0x3]] }
  0x43   : > { %s1723_s26 = sld [smem:[#allocation4 + $0x15]] }
  0x44   : > { %s1725_s27 = sld [smem:[#allocation4]] }
  0x45   : > { %350 = vrot.lane.b32.xlu0 %v1663_v25, %s1580_s30  ;;  %307 = vrot.lane.b32.xlu1 %v1667_v27, %s1579_s29  ;;  %s1729_s29 = sld [smem:[#allocation4 + $0x34]] }
  0x46   : > { %2630 = sst [smem:[#allocation23_spill]] %s1715_s23  ;;  %v574_v6 = vstv %s1715_s23 }
  0x47   : > { %2631 = sst [smem:[#allocation24_spill]] %s1717_s24 }
  0x48   : > { %s1737_s0 = sld [smem:[#allocation4 + $0x3a]]  ;;  %v582_v30 = vstv %s1719_s25 }
  0x49   : > { %357 = vrot.lane.b32.xlu0 %v1661_v24, %s1580_s30  ;;  %352 = vrot.lane.b32.xlu1 %v1671_v29, %s1580_s30  ;;  %2632 = sst [smem:[#allocation25_spill]] %s1723_s26  ;;  %v583_v35 = vmul.f32 %v582_v30, %v1663_v25  ;;  %v584_v36 = vmul.f32 %v582_v30, %v1671_v29 }
  0x4a   : > { %2633 = sst [smem:[#allocation26_spill]] %s1725_s27 }
  0x4b   : > { %s1739_s2 = sld [smem:[#allocation4 + $0xa]]  ;;  %v586_v31 = vstv %s1729_s29 }
  0x4c   : > { %s1741_s16 = sld [smem:[#allocation4 + $0x35]]  ;;  %v587_v37 = vmul.f32 %v586_v31, %v1661_v24  ;;  %v588_v38 = vmul.f32 %v586_v31, %v1667_v27 }
  0x4d   : > { %359 = vrot.lane.b32.xlu1 %v1667_v27, %s1580_s30  ;;  %248 = vrot.lane.b32.xlu0 %v1671_v29, %s1578_s28  ;;  %s1727_s28 = sld [smem:[#allocation4 + $0x33]] }
  0x4e   : > { %s1731_s30 = sld [smem:[#allocation4 + $0x7]]  ;;  %v589_v47 = vadd.f32 %v587_v37, %v583_v35  ;;  %v590_v48 = vadd.f32 %v588_v38, %v584_v36 }
  0x4f   : > { %2638 = sst [smem:[#allocation31_spill]] %s1737_s0 }
  0x50   : > { %s1745_s13 = sld [smem:[#allocation4 + $0xb]]  ;;  %v593_v60 = vcombine.low %v589_v47, %v590_v48 }
  0x51   : > { %404 = vrot.lane.b32.xlu1 %v1671_v29, %s1581_s4  ;;  %402 = vrot.lane.b32.xlu0 %v1663_v25, %s1581_s4  ;;  %s1747_s14 = sld [smem:[#allocation4 + $0x3c]]  ;;  %v682_v39 = vstv %s1739_s2 }
  0x52   : > { %2639 = sst [smem:[#allocation32_spill]] %s1741_s16  ;;  %v683_v43 = vmul.f32 %v682_v39, %v1663_v25  ;;  %v684_v44 = vmul.f32 %v682_v39, %v1671_v29  ;;  %v1872_v12 = vrot.slane %v593_v60, %v1836_v50 }
  0x53   : > { %2634 = sst [smem:[#allocation27_spill]] %s1727_s28 }
  0x54   : > { %2635 = sst [smem:[#allocation28_spill]] %s1731_s30 }
  0x55   : > { %411 = vrot.lane.b32.xlu1 %v1667_v27, %s1581_s4  ;;  %409 = vrot.lane.b32.xlu0 %v1661_v24, %s1581_s4  ;;  %s1733_s4 = sld [smem:[#allocation4 + $0x4]] }
  0x56   : > { %2640 = sst [smem:[#allocation33_spill]] %s1745_s13 }
  0x57   : > { %2641 = sst [smem:[#allocation34_spill]] %s1747_s14 }
  0x58   : > { %s1749_s3 = sld [smem:[#allocation4 + $0x5]] }
  0x59   : > { %456 = vrot.lane.b32.xlu1 %v1671_v29, %s1582_s8  ;;  %454 = vrot.lane.b32.xlu0 %v1663_v25, %s1582_s8  ;;  %s1751_s12 = sld [smem:[#allocation4 + $0xe]] }
  0x5a   : > { %s1753_s1 = sld [smem:[#allocation4 + $0xc]] }
  0x5b   : > { %2636 = sst [smem:[#allocation29_spill]] %s1733_s4 }
  0x5c   : > { %s1755_s30 = sld [smem:[#allocation4 + $0x10]] }
  0x5d   : > { %463 = vrot.lane.b32.xlu1 %v1667_v27, %s1582_s8  ;;  %461 = vrot.lane.b32.xlu0 %v1661_v24, %s1582_s8  ;;  %s1735_s8 = sld [smem:[#allocation4 + $0x9]] }
  0x5e   : > { %2642 = sst [smem:[#allocation35_spill]] %s1749_s3 }
  0x5f   : > { %2643 = sst [smem:[#allocation36_spill]] %s1751_s12 }
  0x60   : > { %2644 = sst [smem:[#allocation37_spill]] %s1753_s1 }
  0x61   : > { %508 = vrot.lane.b32.xlu1 %v1671_v29, %s1583_s21  ;;  %506 = vrot.lane.b32.xlu0 %v1663_v25, %s1583_s21  ;;  %s1759_s0 = sld [smem:[#allocation4 + $0x41]] }
  0x62   : > { %2645 = sst [smem:[#allocation38_spill]] %s1755_s30 }
  0x63   : > { %2637 = sst [smem:[#allocation30_spill]] %s1735_s8 }
  0x64   : > { %s1757_s8 = sld [smem:[#allocation4 + $0x36]] }
  0x65   : > { %515 = vrot.lane.b32.xlu1 %v1667_v27, %s1583_s21  ;;  %513 = vrot.lane.b32.xlu0 %v1661_v24, %s1583_s21  ;;  %s1743_s21 = sld [smem:[#allocation4 + $0x3b]] }
  0x66   : > { %s1761_s4 = sld [smem:[#allocation4 + $0x3d]] }
  0x67   : > { %2647 = sst [smem:[#allocation40_spill]] %s1759_s0 }
  0x68   : > { %s1763_s16 = sld [smem:[#allocation4 + $0x11]] }
  0x69   : > { %s1765_s28 = sld [smem:[#allocation4 + $0x6]] }
  0x6a   : > { %2646 = sst [smem:[#allocation39_spill]] %s1757_s8 }
  0x6b   : > { %s1767_s14 = sld [smem:[#allocation4 + $0x42]]  ;;  %v686_v40 = vstv %s1743_s21 }
  0x6c   : > { %2648 = sst [smem:[#allocation41_spill]] %s1761_s4  ;;  %v687_v45 = vmul.f32 %v686_v40, %v1661_v24  ;;  %v688_v46 = vmul.f32 %v686_v40, %v1667_v27 }
  0x6d   : > { %s1769_s3 = sld [smem:[#allocation4 + $0xd]] }
  0x6e   : > { %s1771_s12 = sld [smem:[#allocation4 + $0x12]]  ;;  %v782_v52 = vstv %s1763_s16  ;;  %v689_v56 = vadd.f32 %v687_v45, %v683_v43  ;;  %v690_v57 = vadd.f32 %v688_v46, %v684_v44 }
  0x6f   : > { %2649 = sst [smem:[#allocation42_spill]] %s1765_s28  ;;  %v783_v62 = vmul.f32 %v782_v52, %v1663_v25  ;;  %v784_v63 = vmul.f32 %v782_v52, %v1671_v29 }
  0x70   : > { %s1773_s1 = sld [smem:[#allocation4 + $0x37]]  ;;  %v693_v7 = vcombine.low %v689_v56, %v690_v57 }
  0x71   : > { %s1775_s30 = sld [smem:[#allocation4 + $0x43]]  ;;  %v786_v53 = vstv %s1767_s14 }
  0x72   : > { %s1777_s8 = sld [smem:[#allocation4 + $0x3e]]  ;;  %v787_v0 = vmul.f32 %v786_v53, %v1661_v24  ;;  %v788_v1 = vmul.f32 %v786_v53, %v1667_v27  ;;  %v1890_v26 = vrot.slane %v693_v7, %v1836_v50 }
  0x73   : > { %2650 = sst [smem:[#allocation43_spill]] %s1769_s3 }
  0x74   : > { %2651 = sst [smem:[#allocation44_spill]] %s1771_s12  ;;  %v789_v14 = vadd.f32 %v787_v0, %v783_v62  ;;  %v790_v15 = vadd.f32 %v788_v1, %v784_v63  ;;  %v1933_v0 = vsub.s32 1, %v1818_v42 }
  0x75   : > { %s1779_s0 = sld [smem:[#allocation4 + $0x13]] }
  0x76   : > { %2652 = sst [smem:[#allocation45_spill]] %s1773_s1  ;;  %v793_v38 = vcombine.low %v789_v14, %v790_v15 }
  0x77   : > { %2653 = sst [smem:[#allocation46_spill]] %s1775_s30 }
  0x78   : > { %2654 = sst [smem:[#allocation47_spill]] %s1777_s8  ;;  %v1927_v62 = vrot.slane %v793_v38, %v1836_v50 }
  0x79   : > { %s1781_s4 = sld [smem:[#allocation4 + $0x44]] }
  0x7a   : > { %s1783_s13 = sld [smem:[#allocation4 + $0x14]] }
  0x7b   : > { %2655 = sst [smem:[#allocation48_spill]] %s1779_s0 }
  0x7c   : > { %s1785_s28 = sld [smem:[#allocation4 + $0x1c]] }
  0x7d   : > { %s1787_s24 = sld [smem:[#allocation4 + $0x1d]] }
  0x7e   : > { %s1789_s3 = sld [smem:[#allocation4 + $0x45]] }
  0x7f   : > { %2656 = sst [smem:[#allocation49_spill]] %s1781_s4 }
  0x80   : > { %2657 = sst [smem:[#allocation50_spill]] %s1783_s13 }
  0x81   : > { %s1791_s27 = sld [smem:[#allocation4 + $0x4e]] }
  0x82   : > { %2658 = sst [smem:[#allocation51_spill]] %s1785_s28 }
  0x83   : > { %s1793_s12 = sld [smem:[#allocation4 + $0x1e]] }
  0x84   : > { %2659 = sst [smem:[#allocation52_spill]] %s1789_s3 }
  0x85   : > { %s1795_s30 = sld [smem:[#allocation4 + $0x4f]] }
  0x86   : > { %s1798_s0 = sld [smem:[#allocation4 + $0x1f]] }
  0x87   : > { %2660 = sst [smem:[#allocation53_spill]] %s1791_s27 }
  0x88   : > { %s1801_s4 = sld [smem:[#allocation4 + $0x50]] }
  0x89   : > { %s1803_s28 = sld [smem:[#allocation4 + $0x20]]  ;;  %v963_v2 = vstv %s1793_s12 }
  0x8a   : > { %s1807_s27 = sld [smem:[#allocation4 + $0x51]] }
  0x8b   : > { %2661 = sst [smem:[#allocation54_spill]] %s1795_s30 }
  0x8c   : > { %s1813_s25 = sld [smem:[#allocation4 + $0x21]]  ;;  %v971_v16 = vstv %s1798_s0 }
  0x8d   : > { %s1815_s29 = sld [smem:[#allocation4 + $0x52]]  ;;  %v972_v30 = vmul.f32 %v971_v16, %v1663_v25  ;;  %v973_v31 = vmul.f32 %v971_v16, %v1671_v29 }
  0x8e   : > { %s1826_s2 = sld [smem:[#allocation4 + $0x53]]  ;;  %v975_v17 = vstv %s1801_s4 }
  0x8f   : > { %2662 = sst [smem:[#allocation55_spill]] %s1803_s28  ;;  %v976_v32 = vmul.f32 %v975_v17, %v1661_v24  ;;  %v977_v33 = vmul.f32 %v975_v17, %v1667_v27 }
  0x90   : > { %2663 = sst [smem:[#allocation56_spill]] %s1807_s27 }
  0x91   : > { %s1820_s28 = sld [smem:[#allocation4 + $0x22]]  ;;  %v978_v48 = vadd.f32 %v976_v32, %v972_v30  ;;  %v979_v52 = vadd.f32 %v977_v33, %v973_v31  ;;  %v1948_v31 = vsub.s32 0, %v1818_v42 }
  0x92   : > { %2664 = sst [smem:[#allocation57_spill]] %s1813_s25  ;;  %v1008_v39 = vstv %s1813_s25 }
  0x93   : > { %2665 = sst [smem:[#allocation58_spill]] %s1815_s29  ;;  %v982_v38 = vcombine.low %v978_v48, %v979_v52 }
  0x94   : > { %2667 = sst [smem:[#allocation60_spill]] %s1826_s2 }
  0x95   : > { %s1828_s21 = sld [smem:[#allocation4 + $0x23]]  ;;  %v1974_v44 = vrot.slane %v982_v38, %v1836_v50 }
  0x96   : > { %s1841_s29 = sld [smem:[#allocation4 + $0x24]] }
  0x97   : > { %2666 = sst [smem:[#allocation59_spill]] %s1820_s28 }
  0x98   : > { %s1833_s28 = sld [smem:[#allocation4 + $0x54]] }
  0x99   : > { %s1850_s14 = sld [smem:[#allocation4 + $0x25]] }
  0x9a   : > { %s2672_s16 = sld [smem:[#allocation26_spill]] }
  0x9b   : > { %2668 = sst [smem:[#allocation61_spill]] %s1828_s21 }
  0x9c   : > { %2669 = sst [smem:[#allocation62_spill]] %s1841_s29 }
  0x9d   : > { %s1845_s21 = sld [smem:[#allocation4 + $0x55]] }
  0x9e   : > { %s2673_s7 = sld [smem:[#allocation24_spill]] }
  0x9f   : > { %2671 = sst [smem:[#allocation64_spill]] %s1850_s14 }
  0xa0   : > { %s1856_s6 = sld [smem:[#allocation4 + $0x56]]  ;;  %v559_v11 = vstv %s2672_s16 }
  0xa1   : > { %s1862_s11 = sld [smem:[#allocation4 + $0x26]] }
  0xa2   : > { %s2675_s10 = sld [smem:[#allocation27_spill]] }
  0xa3   : > { %2670 = sst [smem:[#allocation63_spill]] %s1845_s21 }
  0xa4   : > { %s2676_s9 = sld [smem:[#allocation29_spill]]  ;;  %v951_v13 = vstv %s2673_s7 }
  0xa5   : > { %s2677_s5 = sld [smem:[#allocation28_spill]] }
  0xa6   : > { %2674 = sst [smem:[#allocation65_spill]] %s1856_s6 }
  0xa7   : > { %s2678_s14 = sld [smem:[#allocation30_spill]]  ;;  %v1071_v53 = vstv %s1862_s11 }
  0xa8   : > { %s1867_s21 = sld [smem:[#allocation4 + $0x57]]  ;;  %v577_v18 = vstv %s2675_s10  ;;  %v1072_v15 = vmul.f32 %v1071_v53, %v1663_v25  ;;  %v1073_v16 = vmul.f32 %v1071_v53, %v1671_v29 }
  0xa9   : > { %s2679_s29 = sld [smem:[#allocation32_spill]] }
  0xaa   : > { %s2680_s17 = sld [smem:[#allocation31_spill]]  ;;  %v611_v19 = vstv %s2676_s9 }
  0xab   : > { %s2681_s19 = sld [smem:[#allocation33_spill]]  ;;  %v659_v20 = vstv %s2677_s5  ;;  %v254_v14 = vpop.permute.xlu1 %253  ;;  %v1980_v46 = vpop.permute.xlu0 %246 }
  0xac   : > { %s1875_s15 = sld [smem:[#allocation4 + $0x27]] }
  0xad   : > { %s1879_s23 = sld [smem:[#allocation4 + $0x58]]  ;;  %v674_v21 = vstv %s2678_s14 }
  0xae   : > { %s2683_s20 = sld [smem:[#allocation34_spill]]  ;;  %v1075_v56 = vstv %s1867_s21 }
  0xaf   : > { %s1885_s26 = sld [smem:[#allocation4 + $0x28]]  ;;  %v614_v22 = vstv %s2679_s29  ;;  %v1076_v17 = vmul.f32 %v1075_v56, %v1661_v24  ;;  %v1077_v30 = vmul.f32 %v1075_v56, %v1667_v27  ;;  %v955_v56 = vstv %s1787_s24 }
  0xb0   : > { %v677_v23 = vstv %s2680_s17  ;;  %s2687_s7 = sld [smem:[#allocation36_spill]] }
  0xb1   : > { %s2688_s0 = sld [smem:[#allocation38_spill]]  ;;  %v711_v28 = vstv %s2681_s19  ;;  %v1078_v1 = vadd.f32 %v1076_v17, %v1072_v15  ;;  %v1079_v57 = vadd.f32 %v1077_v30, %v1073_v16 }
  0xb2   : > { %s1893_s4 = sld [smem:[#allocation4 + $0x59]] }
  0xb3   : > { %s2692_s29 = sld [smem:[#allocation40_spill]]  ;;  %v1082_v36 = vcombine.low %v1078_v1, %v1079_v57 }
  0xb4   : > { %s1899_s17 = sld [smem:[#allocation4 + $0x2d]]  ;;  %v714_v37 = vstv %s2683_s20 }
  0xb5   : > { %2684 = sst [smem:[#allocation66_spill]] %s1885_s26 }
  0xb6   : > { %s1905_s19 = sld [smem:[#allocation4 + $0x5e]]  ;;  %v759_v41 = vstv %s2687_s7 }
  0xb7   : > { %s2694_s14 = sld [smem:[#allocation44_spill]]  ;;  %v774_v43 = vstv %s2688_s0 }
  0xb8   : > { %2689 = sst [smem:[#allocation36_spill]] %s1893_s4 }
  0xb9   : > { %s1911_s4 = sld [smem:[#allocation4 + $0x18]]  ;;  %v777_v47 = vstv %s2692_s29 }
  0xba   : > { %s2695_s22 = sld [smem:[#allocation46_spill]]  ;;  %v1171_v48 = vstv %s1899_s17 }
  0xbb   : > { %s1918_s26 = sld [smem:[#allocation4 + $0x49]]  ;;  %v1172_v15 = vmul.f32 %v1171_v48, %v1663_v25  ;;  %v1173_v16 = vmul.f32 %v1171_v48, %v1671_v29 }
  0xbc   : > { %s1922_s16 = sld [smem:[#allocation4 + $0x29]]  ;;  %v1175_v52 = vstv %s1905_s19 }
  0xbd   : > { %v811_v63 = vstv %s2694_s14  ;;  %s1930_s18 = sld [smem:[#allocation4 + $0x5a]]  ;;  %v1176_v17 = vmul.f32 %v1175_v52, %v1661_v24  ;;  %v1177_v30 = vmul.f32 %v1175_v52, %v1667_v27 }
  0xbe   : > { %s1938_s21 = sld [smem:[#allocation4 + $0x2a]] }
  0xbf   : > { %s2699_s1 = sld [smem:[#allocation53_spill]]  ;;  %v882_v33 = vstv %s1911_s4  ;;  %v1178_v57 = vadd.f32 %v1176_v17, %v1172_v15  ;;  %v1179_v1 = vadd.f32 %v1177_v30, %v1173_v16  ;;  %v2026_v17 = vrot.slane %v1082_v36, %v1836_v50 }
  0xc0   : > { %v814_v7 = vstv %s2695_s22  ;;  %s1945_s8 = sld [smem:[#allocation4 + $0x5b]]  ;;  %v883_v32 = vmul.f32 %v882_v33, %v1663_v25  ;;  %v884_v48 = vmul.f32 %v882_v33, %v1671_v29  ;;  %v1051_v25 = vstv %s1833_s28  ;;  %v299_v29 = vpop.permute.xlu0 %298 }
  0xc1   : > { %s1952_s5 = sld [smem:[#allocation4 + $0x2b]]  ;;  %v886_v34 = vstv %s1918_s26 }
  0xc2   : > { %s1959_s9 = sld [smem:[#allocation4 + $0x5c]]  ;;  %v887_v53 = vmul.f32 %v886_v34, %v1661_v24  ;;  %v888_v52 = vmul.f32 %v886_v34, %v1667_v27  ;;  %v256_v24 = vpop.permute.xlu1 %255 }
  0xc3   : > { %s1963_s10 = sld [smem:[#allocation4 + $0x2c]]  ;;  %v257_v33 = vsel %vm250_vm1, %v254_v14, %v256_v24  ;;  %v258_v40 = vsel %vm250_vm1, %v256_v24, %v254_v14 }
  0xc4   : > { %s1968_s13 = sld [smem:[#allocation4 + $0x5d]]  ;;  %v889_v45 = vadd.f32 %v887_v53, %v883_v32  ;;  %v890_v35 = vadd.f32 %v888_v52, %v884_v48  ;;  %v281_v10 = vcombine.low %v258_v40, %v257_v33  ;;  %v306_v53 = vpop.permute.xlu0 %305  ;;  %v1182_v33 = vcombine.low %v1178_v57, %v1179_v1 }
  0xc5   : > { %v958_v42 = vstv %s2699_s1  ;;  %s1978_s11 = sld [smem:[#allocation4 + $0x2e]] }
  0xc6   : > { %s1986_s26 = sld [smem:[#allocation4 + $0x5f]]  ;;  %v288_v40 = vrot.slane %v281_v10, %v1836_v50  ;;  %v301_v48 = vpop.permute.xlu1 %300  ;;  %v893_v10 = vcombine.low %v889_v45, %v890_v35  ;;  %v1151_v57 = vstv %s1945_s8  ;;  %v2059_v45 = vrot.slane %v1182_v33, %v1836_v50 }
  0xc7   : > { %s2707_s20 = sld [smem:[#allocation70_spill]]  ;;  %v303_v24 = vsel %vm302_vm2, %v299_v29, %v301_v48  ;;  %v304_v32 = vsel %vm302_vm2, %v301_v48, %v299_v29 }
  0xc8   : > { %s1993_s30 = sld [smem:[#allocation4 + $0x2f]]  ;;  %v314_v30 = vcombine.low %v304_v32, %v303_v24  ;;  %v295_v52 = vrot.slane %v288_v40, %v1836_v50  ;;  %v351_v48 = vpop.permute.xlu0 %350  ;;  %v2070_v60 = vrot.slane %v893_v10, %v1836_v50 }
  0xc9   : > { %2701 = sst [smem:[#allocation38_spill]] %s1963_s10 }
  0xca   : > { %s2709_s22 = sld [smem:[#allocation62_spill]]  ;;  %v321_v29 = vrot.slane %v314_v30, %v1836_v50  ;;  %v308_v35 = vpop.permute.xlu1 %307 }
  0xcb   : > { %2703 = sst [smem:[#allocation53_spill]] %s1978_s11  ;;  %v309_v40 = vsel %vm302_vm2, %v306_v53, %v308_v35  ;;  %v310_v15 = vsel %vm302_vm2, %v308_v35, %v306_v53  ;;  %vm852_vm2 = vcmp.ge.s32.totalorder %v1831_v49, 16 }
  0xcc   : > { %2706 = sst [smem:[#allocation67_spill]] %s1986_s26  ;;  %v328_v33 = vrot.slane %v321_v29, %v1836_v50  ;;  %v333_v16 = vcombine.low %v310_v15, %v309_v40  ;;  %v358_v36 = vpop.permute.xlu0 %357 }
  0xcd   : > { %v1991_v38 = vld [vmem:[%s2707_s20] sm:$0x3]  ;;  %s2710_s14 = sld [smem:[#allocation63_spill]] }
  0xce   : > { %2708 = sst [smem:[#allocation68_spill]] %s1993_s30  ;;  %vm259_vm3 = vcmp.ge.s32.totalorder %v1991_v38, 3  ;;  %vm311_vm5 = vcmp.ge.s32.totalorder %v1991_v38, 2  ;;  %vm363_vm6 = vcmp.ge.s32.totalorder %v1991_v38, 1  ;;  %v340_v10 = vrot.slane %v333_v16, %v1836_v50  ;;  %v353_v15 = vpop.permute.xlu1 %352 }
  0xcf   : > { %s2002_s29 = sld [smem:[#allocation4 + $0x60]]  ;;  %v297_v53 = vsel %vm259_vm3, %v295_v52, 0.0  ;;  %v355_v32 = vsel %vm354_vm4, %v351_v48, %v353_v15  ;;  %v356_v52 = vsel %vm354_vm4, %v353_v15, %v351_v48  ;;  %v2099_v29 = vsel %vm311_vm5, %v328_v33, 0.0 }
  0xd0   : > { %s2009_s20 = sld [smem:[#allocation4 + $0x30]]  ;;  %v1055_v27 = vstv %s2709_s22  ;;  %v2095_v14 = vmul.f32 %v862_v51, %v297_v53  ;;  %v347_v24 = vrot.slane %v340_v10, %v1836_v50  ;;  %v366_v40 = vcombine.low %v356_v52, %v355_v32 }
  0xd1   : > { %s2711_s27 = sld [smem:[#allocation64_spill]]  ;;  %v2104_v35 = vmul.f32 %v562_v54, %v297_v53  ;;  %v2108_v48 = vmul.f32 %v662_v55, %v297_v53  ;;  %v2112_v15 = vmul.f32 %v762_v61, %v297_v53  ;;  %v2116_v30 = vmul.f32 %v951_v13, %v297_v53  ;;  %v249_v54 = vpop.permute.xlu0 %248 }
  0xd2   : > { %s2014_s17 = sld [smem:[#allocation4 + $0x61]]  ;;  %v2120_v51 = vsel %vm311_vm5, %v347_v24, 0.0  ;;  %v373_v33 = vrot.slane %v366_v40, %v1836_v50  ;;  %v360_v32 = vpop.permute.xlu1 %359  ;;  %v2125_v55 = vmul.f32 %v1051_v25, %v297_v53  ;;  %v2127_v61 = vmul.f32 %v1151_v57, %v297_v53 }
  0xd3   : > { %v1058_v34 = vstv %s2710_s14  ;;  %s2713_s2 = sld [smem:[#allocation36_spill]]  ;;  %v2132_v13 = vmul.f32 %v866_v58, %v2099_v29  ;;  %v361_v24 = vsel %vm354_vm4, %v358_v36, %v360_v32  ;;  %v362_v10 = vsel %vm354_vm4, %v360_v32, %v358_v36 }
  0xd4   : > { %s2020_s19 = sld [smem:[#allocation4 + $0x17]]  ;;  %v251_v40 = vsel %vm250_vm1, %v1980_v46, %v249_v54  ;;  %v380_v25 = vrot.slane %v373_v33, %v1836_v50  ;;  %v385_v57 = vcombine.low %v362_v10, %v361_v24  ;;  %v252_v58 = vsel %vm250_vm1, %v249_v54, %v1980_v46 }
  0xd5   : > { %s2028_s3 = sld [smem:[#allocation4 + $0x48]]  ;;  %vm415_vm8 = vcmp.lt.s32.totalorder %v1991_v38, 15  ;;  %v567_v36 = vmul.f32 %v566_v59, %v2099_v29  ;;  %v262_v53 = vcombine.low %v252_v58, %v251_v40  ;;  %v570_v52 = vmul.f32 %v569_v3, %v2120_v51  ;;  %v403_v24 = vpop.permute.xlu0 %402 }
  0xd6   : > { %s2035_s25 = sld [smem:[#allocation4 + $0x19]]  ;;  %v667_v33 = vmul.f32 %v666_v4, %v2099_v29  ;;  %v767_v46 = vmul.f32 %v766_v8, %v2099_v29  ;;  %v2161_v32 = vsel %vm363_vm6, %v380_v25, 0.0  ;;  %v392_v54 = vrot.slane %v385_v57, %v1836_v50  ;;  %v405_v59 = vpop.permute.xlu1 %404 }
  0xd7   : > { %s2040_s6 = sld [smem:[#allocation4 + $0x4a]]  ;;  %v670_v3 = vmul.f32 %v669_v5, %v2120_v51  ;;  %v956_v10 = vmul.f32 %v955_v56, %v2099_v29  ;;  %v269_v4 = vrot.slane %v262_v53, %v1836_v50  ;;  %v407_v8 = vsel %vm406_vm7, %v403_v24, %v405_v59 }
  0xd8   : > { %s2047_s4 = sld [smem:[#allocation4 + $0x1a]]  ;;  %v408_v40 = vsel %vm406_vm7, %v405_v59, %v403_v24  ;;  %v770_v25 = vmul.f32 %v769_v9, %v2120_v51  ;;  %v399_v57 = vrot.slane %v392_v54, %v1836_v50  ;;  %v959_v5 = vmul.f32 %v958_v42, %v2120_v51 }
  0xd9   : > { %v418_v58 = vcombine.low %v407_v8, %v408_v40  ;;  %v1056_v56 = vmul.f32 %v1055_v27, %v2099_v29  ;;  %v276_v53 = vrot.slane %v269_v4, %v1836_v50  ;;  %v571_v16 = vadd.f32 %v570_v52, %v567_v36  ;;  %v410_v54 = vpop.permute.xlu0 %409  ;;  %s2741_s10 = sld [smem:[#allocation51_spill]] }
  0xda   : > { %v575_v1 = vmul.f32 %v574_v6, %v2161_v32  ;;  %v1059_v59 = vmul.f32 %v1058_v34, %v2120_v51  ;;  %v2194_v9 = vsel %vm363_vm6, %v399_v57, 0.0  ;;  %v412_v27 = vpop.permute.xlu1 %411  ;;  %v671_v36 = vadd.f32 %v670_v3, %v667_v33  ;;  %s2743_s28 = sld [smem:[#allocation37_spill]] }
  0xdb   : > { %2714 = sst [smem:[#allocation62_spill]] %s2028_s3  ;;  %v425_v42 = vrot.slane %v418_v58, %v1836_v50  ;;  %v675_v6 = vmul.f32 %v674_v21, %v2161_v32  ;;  %v2202_v52 = vsel %vm259_vm3, %v276_v53, 0.0  ;;  %v413_v34 = vsel %vm406_vm7, %v410_v54, %v412_v27 }
  0xdc   : > { %v414_v24 = vsel %vm406_vm7, %v412_v27, %v410_v54  ;;  %vm467_vm10 = vcmp.lt.s32.totalorder %v1991_v38, 14  ;;  %v771_v4 = vadd.f32 %v770_v25, %v767_v46  ;;  %v560_v21 = vmul.f32 %v559_v11, %v2202_v52  ;;  %s2742_s3 = sld [smem:[#allocation35_spill]] }
  0xdd   : > { %v432_v33 = vrot.slane %v425_v42, %v1836_v50  ;;  %v437_v3 = vcombine.low %v413_v34, %v414_v24  ;;  %v775_v8 = vmul.f32 %v774_v43, %v2161_v32  ;;  %v578_v40 = vmul.f32 %v577_v18, %v2194_v9  ;;  %v455_v42 = vpop.permute.xlu0 %454  ;;  %s2746_s26 = sld [smem:[#allocation54_spill]] }
  0xde   : > { %2715 = sst [smem:[#allocation63_spill]] %s2047_s4  ;;  %v660_v57 = vmul.f32 %v659_v20, %v2202_v52  ;;  %v760_v46 = vmul.f32 %v759_v41, %v2202_v52  ;;  %v2226_v25 = vadd.f32 %v959_v5, %v956_v10  ;;  %v457_v53 = vpop.permute.xlu1 %456  ;;  %v564_v11 = vadd.f32 %v2104_v35, %v560_v21 }
  0xdf   : > { %v444_v58 = vrot.slane %v437_v3, %v1836_v50  ;;  %v678_v43 = vmul.f32 %v677_v23, %v2194_v9  ;;  %v2236_v18 = vmul.f32 %v963_v2, %v2161_v32  ;;  %v2240_v20 = vsel %vm415_vm8, %v432_v33, 0.0  ;;  %s2747_s24 = sld [smem:[#allocation39_spill]] }
  0xe0   : > { %v459_v41 = vsel %vm458_vm9, %v455_v42, %v457_v53  ;;  %v460_v10 = vsel %vm458_vm9, %v457_v53, %v455_v42  ;;  %v664_v35 = vadd.f32 %v2108_v48, %v660_v57  ;;  %v572_v27 = vadd.f32 %v571_v16, %v564_v11  ;;  %s2749_s1 = sld [smem:[#allocation41_spill]] }
  0xe1   : > { %v451_v5 = vrot.slane %v444_v58, %v1836_v50  ;;  %v470_v23 = vcombine.low %v459_v41, %v460_v10  ;;  %v2248_v2 = vadd.f32 %v1059_v59, %v1056_v56  ;;  %v579_v54 = vadd.f32 %v578_v40, %v575_v1  ;;  %v462_v16 = vpop.permute.xlu0 %461  ;;  %s2752_s22 = sld [smem:[#allocation48_spill]] }
  0xe2   : > { %v672_v34 = vadd.f32 %v671_v36, %v664_v35  ;;  %v764_v24 = vadd.f32 %v2112_v15, %v760_v46  ;;  %v778_v33 = vmul.f32 %v777_v47, %v2194_v9  ;;  %v464_v21 = vpop.permute.xlu1 %463  ;;  %v612_v1 = vmul.f32 %v611_v19, %v2240_v20  ;;  %s2753_s14 = sld [smem:[#allocation49_spill]] }
  0xe3   : > { %v2256_v3 = vsel %vm415_vm8, %v451_v5, 0.0  ;;  %v477_v48 = vrot.slane %v470_v23, %v1836_v50  ;;  %v679_v56 = vadd.f32 %v678_v43, %v675_v6  ;;  %v465_v15 = vsel %vm458_vm9, %v462_v16, %v464_v21  ;;  %s2757_s4 = sld [smem:[#allocation55_spill]] }
  0xe4   : > { %v466_v47 = vsel %vm458_vm9, %v464_v21, %v462_v16  ;;  %vm519_vm12 = vcmp.lt.s32.totalorder %v1991_v38, 13  ;;  %v580_v59 = vadd.f32 %v579_v54, %v572_v27  ;;  %v615_v36 = vmul.f32 %v614_v22, %v2256_v3  ;;  %s2760_s7 = sld [smem:[#allocation42_spill]] }
  0xe5   : > { %v484_v40 = vrot.slane %v477_v48, %v1836_v50  ;;  %v489_v57 = vcombine.low %v465_v15, %v466_v47  ;;  %v680_v46 = vadd.f32 %v679_v56, %v672_v34  ;;  %v715_v19 = vmul.f32 %v714_v37, %v2256_v3  ;;  %v507_v41 = vpop.permute.xlu0 %506  ;;  %s2761_s12 = sld [smem:[#allocation43_spill]] }
  0xe6   : > { %v712_v6 = vmul.f32 %v711_v28, %v2240_v20  ;;  %v772_v58 = vadd.f32 %v771_v4, %v764_v24  ;;  %v779_v53 = vadd.f32 %v778_v33, %v775_v8  ;;  %v812_v42 = vmul.f32 %v811_v63, %v2240_v20  ;;  %v509_v43 = vpop.permute.xlu1 %508  ;;  %s2763_s0 = sld [smem:[#allocation50_spill]] }
  0xe7   : > { %v2282_v22 = vsel %vm467_vm10, %v484_v40, 0.0  ;;  %v496_v11 = vrot.slane %v489_v57, %v1836_v50  ;;  %v815_v37 = vmul.f32 %v814_v7, %v2256_v3  ;;  %v2744_v28 = vstv %s2741_s10  ;;  %s2764_s8 = sld [smem:[#allocation56_spill]] }
  0xe8   : > { %v949_v4 = vmul.f32 %v2744_v28, %v2202_v52  ;;  %v511_v8 = vsel %vm510_vm11, %v507_v41, %v509_v43  ;;  %v512_v63 = vsel %vm510_vm11, %v509_v43, %v507_v41  ;;  %v2745_v10 = vrot.slane %v1872_v12, %v1836_v50  ;;  %s2766_s30 = sld [smem:[#allocation58_spill]] }
  0xe9   : > { %v616_v5 = vadd.f32 %v615_v36, %v612_v1  ;;  %v503_v23 = vrot.slane %v496_v11, %v1836_v50  ;;  %v522_v27 = vcombine.low %v511_v8, %v512_v63  ;;  %v2748_v7 = vrot.slane %v1890_v26, %v1836_v50  ;;  %v514_v15 = vpop.permute.xlu0 %513  ;;  %s2767_s10 = sld [smem:[#allocation61_spill]] }
  0xea   : > { %v609_v35 = vadd.f32 %v2745_v10, %v580_v59  ;;  %v716_v34 = vadd.f32 %v715_v19, %v712_v6  ;;  %v2750_v24 = vstv %s2742_s3  ;;  %v2751_v48 = vstv %s2743_s28  ;;  %v516_v56 = vpop.permute.xlu1 %515  ;;  %s2768_s3 = sld [smem:[#allocation45_spill]] }
  0xeb   : > { %v709_v54 = vadd.f32 %v2748_v7, %v680_v46  ;;  %v620_v33 = vmul.f32 %v2750_v24, %v2282_v22  ;;  %v720_v12 = vmul.f32 %v2751_v48, %v2282_v22  ;;  %v780_v21 = vadd.f32 %v779_v53, %v772_v58  ;;  %s2769_s28 = sld [smem:[#allocation47_spill]] }
  0xec   : > { %v953_v16 = vadd.f32 %v2116_v30, %v949_v4  ;;  %v2311_v1 = vsel %vm467_vm10, %v503_v23, 0.0  ;;  %v529_v26 = vrot.slane %v522_v27, %v1836_v50  ;;  %v816_v47 = vadd.f32 %v815_v37, %v812_v42  ;;  %s2826_s11 = sld [smem:[#allocation72_spill]] }
  0xed   : > { %v2754_v59 = vstv %s2746_s26  ;;  %v517_v40 = vsel %vm510_vm11, %v514_v15, %v516_v56  ;;  %v518_v57 = vsel %vm510_vm11, %v516_v56, %v514_v15  ;;  %v2755_v30 = vstv %s2747_s24  ;;  %s2771_s26 = sld [smem:[#allocation52_spill]] }
  0xee   : > { %v967_v36 = vmul.f32 %v2754_v59, %v2194_v9  ;;  %v623_v46 = vmul.f32 %v2755_v30, %v2311_v1  ;;  %v2756_v19 = vstv %s2749_s1  ;;  %v536_v58 = vrot.slane %v529_v26, %v1836_v50  ;;  %s2773_s24 = sld [smem:[#allocation60_spill]] }
  0xef   : > { %v723_v6 = vmul.f32 %v2756_v19, %v2311_v1  ;;  %v541_v53 = vcombine.low %v517_v40, %v518_v57  ;;  %v2758_v42 = vstv %s2752_s22  ;;  %v2759_v43 = vstv %s2753_s14  ;;  %s2776_s1 = sld [smem:[#allocation65_spill]] }
  0xf0   : > { %v820_v11 = vmul.f32 %v2758_v42, %v2282_v22  ;;  %v823_v41 = vmul.f32 %v2759_v43, %v2311_v1  ;;  %v624_v37 = vadd.f32 %v623_v46, %v620_v33  ;;  %v2762_v4 = vrot.slane %v1927_v62, %v1836_v50  ;;  %s2778_s22 = sld [smem:[#allocation59_spill]] }
  0xf1   : > { %v724_v28 = vadd.f32 %v723_v6, %v720_v12  ;;  %v961_v63 = vadd.f32 %v2226_v25, %v953_v16  ;;  %v2340_v10 = vsel %vm519_vm12, %v536_v58, 0.0  ;;  %v548_v23 = vrot.slane %v541_v53, %v1836_v50  ;;  %s2385_s14 = sld [smem:[#allocation4 + $0x4b]] }
  0xf2   : > { %v809_v8 = vadd.f32 %v2762_v4, %v780_v21  ;;  %v617_v27 = vadd.f32 %v616_v5, %v609_v35  ;;  %v717_v7 = vadd.f32 %v716_v34, %v709_v54  ;;  %v824_v33 = vadd.f32 %v823_v41, %v820_v11 }
  0xf3   : > { %v968_v62 = vadd.f32 %v967_v36, %v2236_v18  ;;  %v2770_v25 = vstv %s2757_s4  ;;  %v555_v12 = vrot.slane %v548_v23, %v1836_v50  ;;  %v2772_v16 = vstv %s2760_s7  ;;  %s2790_s4 = sld [smem:[#allocation66_spill]] }
  0xf4   : > { %v817_v24 = vadd.f32 %v816_v47, %v809_v8  ;;  %v1001_v48 = vmul.f32 %v2770_v25, %v2240_v20  ;;  %v625_v21 = vadd.f32 %v624_v37, %v617_v27  ;;  %v628_v35 = vmul.f32 %v2772_v16, %v2340_v10  ;;  %s2404_s7 = sld [smem:[#allocation4 + $0x1b]] }
  0xf5   : > { %v725_v5 = vadd.f32 %v724_v28, %v717_v7  ;;  %v2774_v54 = vstv %s2761_s12  ;;  %v2775_v26 = vstv %s2763_s0  ;;  %v969_v56 = vadd.f32 %v968_v62, %v961_v63  ;;  %s2801_s12 = sld [smem:[#allocation38_spill]] }
  0xf6   : > { %v728_v34 = vmul.f32 %v2774_v54, %v2340_v10  ;;  %v828_v18 = vmul.f32 %v2775_v26, %v2340_v10  ;;  %v2777_v15 = vstv %s2764_s8  ;;  %v2362_v59 = vsel %vm519_vm12, %v555_v12, 0.0  ;;  %s2805_s0 = sld [smem:[#allocation53_spill]] }
  0xf7   : > { %v1004_v47 = vmul.f32 %v2777_v15, %v2256_v3  ;;  %v1009_v36 = vmul.f32 %v1008_v39, %v2282_v22  ;;  %v2779_v40 = vstv %s2766_s30  ;;  %v2780_v30 = vstv %s2767_s10 }
  0xf8   : > { %v1012_v57 = vmul.f32 %v2779_v40, %v2311_v1  ;;  %v1049_v46 = vmul.f32 %v2780_v30, %v2202_v52  ;;  %v2781_v19 = vstv %s2768_s3  ;;  %v2782_v58 = vstv %s2769_s28 }
  0xf9   : > { %v631_v6 = vmul.f32 %v2781_v19, %v2362_v59  ;;  %v731_v53 = vmul.f32 %v2782_v58, %v2362_v59  ;;  %v2783_v38 = vstv %s2771_s26  ;;  %v2784_v11 = vstv %s2711_s27  ;;  %s2789_s27 = sld [smem:[#allocation18_spill]] }
  0xfa   : > { %v831_v42 = vmul.f32 %v2783_v38, %v2362_v59  ;;  %v1064_v43 = vmul.f32 %v2784_v11, %v2161_v32  ;;  %v1005_v39 = vadd.f32 %v1004_v47, %v1001_v48  ;;  %v2785_v41 = vstv %s2773_s24 }
  0xfb   : > { %v1020_v37 = vmul.f32 %v2785_v41, %v2362_v59  ;;  %v1053_v28 = vadd.f32 %v2125_v55, %v1049_v46  ;;  %v2786_v4 = vstv %s2776_s1  ;;  %v632_v63 = vadd.f32 %v631_v6, %v628_v35 }
  0xfc   : > { %v1067_v8 = vmul.f32 %v2786_v4, %v2194_v9  ;;  %v732_v23 = vadd.f32 %v731_v53, %v728_v34  ;;  %v2787_v27 = vrot.slane %v1974_v44, %v1836_v50  ;;  %v2788_v62 = vstv %s2778_s22 }
  0xfd   : > { %v1017_v25 = vmul.f32 %v2788_v62, %v2340_v10  ;;  %v832_v48 = vadd.f32 %v831_v42, %v828_v18  ;;  %v1013_v12 = vadd.f32 %v1012_v57, %v1009_v36  ;;  %v1061_v55 = vadd.f32 %v2248_v2, %v1053_v28 }
  0xfe   : > { %v998_v7 = vadd.f32 %v2787_v27, %v969_v56  ;;  %v1068_v16 = vadd.f32 %v1067_v8, %v1064_v43  ;;  %v633_v54 = vadd.f32 %v632_v63, %v625_v21  ;;  %v733_v35 = vadd.f32 %v732_v23, %v725_v5 }
  0xff   : > { %v825_v26 = vadd.f32 %v824_v33, %v817_v24  ;;  %v2791_v34 = vstv %s1952_s5  ;;  %v1021_v56 = vadd.f32 %v1020_v37, %v1017_v25  ;;  %v2792_v18 = vstv %s1879_s23  ;;  %s1585_s5 = smov 48   ;;  %s2797_s23 = sld [smem:[#allocation25_spill]] }
 0x100   : > { %v1156_v15 = vmul.f32 %v2791_v34, %v2099_v29  ;;  %v1006_v44 = vadd.f32 %v1005_v39, %v998_v7  ;;  %v1069_v47 = vadd.f32 %v1068_v16, %v1061_v55  ;;  %v1104_v36 = vmul.f32 %v2792_v18, %v2256_v3 }
 0x101   : > { %v642_v40 = vrot.slane %v633_v54, %v1933_v0  ;;  %v638_v2 = vrot.slane %v633_v54, %v1948_v31  ;;  %v2793_v21 = vstv %s1875_s15  ;;  %v2794_v24 = vstv %s2713_s2  ;;  %s2798_s15 = sld [smem:[#allocation67_spill]] }
 0x102   : > { %v1101_v5 = vmul.f32 %v2793_v21, %v2240_v20  ;;  %v1112_v29 = vmul.f32 %v2794_v24, %v2311_v1  ;;  %v2795_v33 = vstv %s2789_s27  ;;  %v833_v30 = vadd.f32 %v832_v48, %v825_v26  ;;  %s2426_s2 = sld [smem:[#allocation4 + $0x4c]] }
 0x103   : > { %v870_v57 = vmul.f32 %v2795_v33, %v2120_v51  ;;  %v1014_v46 = vadd.f32 %v1013_v12, %v1006_v44  ;;  %v2796_v19 = vstv %s2790_s4  ;;  %647 = vrot.lane.b32.xlu1 %v642_v40, %s1585_s5  ;;  %645 = vrot.lane.b32.xlu0 %v638_v2, %s1585_s5  ;;  %v742_v58 = vrot.slane %v733_v35, %v1933_v0 }
 0x104   : > { %v1109_v6 = vmul.f32 %v2796_v19, %v2282_v22  ;;  %v738_v53 = vrot.slane %v733_v35, %v1948_v31  ;;  %v1105_v38 = vadd.f32 %v1104_v36, %v1101_v5  ;;  %v922_v42 = vstv %s2385_s14 }
 0x105   : > { %v1022_v11 = vadd.f32 %v1021_v56, %v1014_v46  ;;  %v2799_v43 = vrot.slane %v2026_v17, %v1836_v50  ;;  %v2800_v41 = vstv %s1930_s18  ;;  %v2802_v28 = vstv %s1938_s21  ;;  %s1586_s18 = smov 32   ;;  %s1588_s21 = smov 112  }
 0x106   : > { %v1120_v37 = vmul.f32 %v2800_v41, %v2362_v59  ;;  %v1149_v4 = vmul.f32 %v2802_v28, %v2202_v52  ;;  %v1113_v8 = vadd.f32 %v1112_v29, %v1109_v6  ;;  %v2803_v63 = vstv %s1922_s16  ;;  %s2809_s16 = sld [smem:[#allocation68_spill]] }
 0x107   : > { %v1098_v39 = vadd.f32 %v2799_v43, %v1069_v47  ;;  %v1117_v23 = vmul.f32 %v2803_v63, %v2340_v10  ;;  %v2804_v27 = vstv %s1959_s9  ;;  %v2806_v62 = vstv %s1968_s13  ;;  %747 = vrot.lane.b32.xlu1 %v742_v58, %s1586_s18  ;;  %745 = vrot.lane.b32.xlu0 %v738_v53, %s1586_s18  ;;  %s2813_s13 = sld [smem:[#allocation62_spill]]  ;;  %s1587_s9 = smov 16  }
 0x108   : > { %v1159_v7 = vmul.f32 %v2804_v27, %v2120_v51  ;;  %v1167_v17 = vmul.f32 %v2806_v62, %v2194_v9  ;;  %v2807_v25 = vstv %s2797_s23  ;;  %v1153_v55 = vadd.f32 %v2127_v61, %v1149_v4 }
 0x109   : > { %v860_v48 = vmul.f32 %v2807_v25, %v2202_v52  ;;  %v1106_v12 = vadd.f32 %v1105_v38, %v1098_v39  ;;  %v2808_v16 = vstv %s2798_s15  ;;  %v1121_v35 = vadd.f32 %v1120_v37, %v1117_v23 }
 0x10a   : > { %v1204_v54 = vmul.f32 %v2808_v16, %v2256_v3  ;;  %v1160_v51 = vadd.f32 %v1159_v7, %v1156_v15  ;;  %v2810_v26 = vstv %s2801_s12  ;;  %v927_v44 = vstv %s2404_s7 }
 0x10b   : > { %v1164_v34 = vmul.f32 %v2810_v26, %v2161_v32  ;;  %v842_v56 = vrot.slane %v833_v30, %v1933_v0  ;;  %v838_v52 = vrot.slane %v833_v30, %v1948_v31  ;;  %v2811_v61 = vstv %s2805_s0 }
 0x10c   : > { %v1201_v47 = vmul.f32 %v2811_v61, %v2240_v20  ;;  %v2812_v18 = vstv %s2002_s29  ;;  %v1031_v40 = vrot.slane %v1022_v11, %v1933_v0  ;;  %v1114_v2 = vadd.f32 %v1113_v8, %v1106_v12  ;;  %s2816_s29 = sld [smem:[#allocation63_spill]] }
 0x10d   : > { %v1212_v36 = vmul.f32 %v2812_v18, %v2311_v1  ;;  %v1161_v15 = vadd.f32 %v1160_v51, %v1153_v55  ;;  %v1168_v21 = vadd.f32 %v1167_v17, %v1164_v34  ;;  %v1027_v5 = vrot.slane %v1022_v11, %v1948_v31  ;;  %847 = vrot.lane.b32.xlu1 %v842_v56, %s1587_s9 }
 0x10e   : > { %v1205_v24 = vadd.f32 %v1204_v54, %v1201_v47  ;;  %v2814_v29 = vstv %s2809_s16  ;;  %v2815_v30 = vstv %s2014_s17  ;;  %845 = vrot.lane.b32.xlu0 %v838_v52, %s1587_s9  ;;  %v1122_v19 = vadd.f32 %v1121_v35, %v1114_v2  ;;  %s2825_s17 = sld [smem:[#allocation10_spill]] }
 0x10f   : > { %v1209_v33 = vmul.f32 %v2814_v29, %v2282_v22  ;;  %v1220_v46 = vmul.f32 %v2815_v30, %v2362_v59  ;;  %v1169_v6 = vadd.f32 %v1168_v21, %v1161_v15  ;;  %v2817_v58 = vstv %s2009_s20 }
 0x110   : > { %v1217_v53 = vmul.f32 %v2817_v58, %v2340_v10  ;;  %v930_v38 = vstv %s2426_s2  ;;  %v864_v43 = vadd.f32 %v2095_v14, %v860_v48  ;;  %v871_v39 = vadd.f32 %v870_v57, %v2132_v13 }
 0x111   : > { %v1213_v11 = vadd.f32 %v1212_v36, %v1209_v33  ;;  %v2818_v41 = vstv %s2020_s19  ;;  %v2819_v28 = vrot.slane %v2059_v45, %v1836_v50  ;;  %v2820_v8 = vstv %s2813_s13  ;;  %1036 = vrot.lane.b32.xlu1 %v1031_v40, %s1588_s21 }
 0x112   : > { %v875_v37 = vmul.f32 %v2818_v41, %v2161_v32  ;;  %v878_v63 = vmul.f32 %v2820_v8, %v2194_v9  ;;  %v2821_v23 = vstv %s2035_s25  ;;  %v2822_v7 = vstv %s2040_s6  ;;  %1034 = vrot.lane.b32.xlu0 %v1027_v5, %s1588_s21  ;;  %s1589_s6 = smov 96   ;;  %s1590_s25 = smov 80  }
 0x113   : > { %v1198_v4 = vadd.f32 %v2819_v28, %v1169_v6  ;;  %v912_v27 = vmul.f32 %v2821_v23, %v2240_v20  ;;  %v915_v62 = vmul.f32 %v2822_v7, %v2256_v3  ;;  %v1221_v17 = vadd.f32 %v1220_v46, %v1217_v53 }
 0x114   : > { %v872_v14 = vadd.f32 %v871_v39, %v864_v43  ;;  %v2823_v13 = vstv %s2816_s29  ;;  %v923_v32 = vmul.f32 %v922_v42, %v2311_v1  ;;  %v879_v25 = vadd.f32 %v878_v63, %v875_v37  ;;  %s1374_s19 = sshll.u32 %s2825_s17, 1 }
 0x115   : > { %v920_v57 = vmul.f32 %v2823_v13, %v2282_v22  ;;  %v1206_v45 = vadd.f32 %v1205_v24, %v1198_v4  ;;  %v916_v48 = vadd.f32 %v915_v62, %v912_v27  ;;  %v928_v12 = vmul.f32 %v927_v44, %v2340_v10  ;;  %s208_s30 = scalar_lea.vmem %s2826_s11, %s1374_s19 }
 0x116   : > { %v931_v20 = vmul.f32 %v930_v38, %v2362_v59  ;;  %v1131_v3 = vrot.slane %v1122_v19, %v1933_v0  ;;  %v1127_v55 = vrot.slane %v1122_v19, %v1948_v31  ;;  %v880_v54 = vadd.f32 %v879_v25, %v872_v14 }
 0x117   : > { %v924_v9 = vadd.f32 %v923_v32, %v920_v57  ;;  %v1214_v16 = vadd.f32 %v1213_v11, %v1206_v45  ;;  %v2824_v42 = vrot.slane %v2070_v60, %v1836_v50  ;;  %vm849_vm1 = vcmp.lt.s32.totalorder %v1831_v49, 16 }
 0x118   : > { %v932_v22 = vadd.f32 %v931_v20, %v928_v12  ;;  %1136 = vrot.lane.b32.xlu1 %v1131_v3, %s1589_s6  ;;  %1134 = vrot.lane.b32.xlu0 %v1127_v55, %s1589_s6  ;;  %v245_v5 = vadd.s32 128, %v1831_v49  ;;  %vm1038_vm3 = vcmp.lt.s32.totalorder %v1831_v49, 112  ;;  %vm1138_vm5 = vcmp.lt.s32.totalorder %v1831_v49, 96 }
 0x119   : > { %v1222_v1 = vadd.f32 %v1221_v17, %v1214_v16  ;;  %v909_v35 = vadd.f32 %v2824_v42, %v880_v54  ;;  %vm1238_vm7 = vcmp.lt.s32.totalorder %v1831_v49, 80 }
 0x11a   : > { %vm1042_vm4 = vcmp.lt.s32.totalorder %v245_v5, 240  ;;  %vm1142_vm6 = vcmp.lt.s32.totalorder %v245_v5, 224  ;;  %vm1242_vm8 = vcmp.lt.s32.totalorder %v245_v5, 208 }
 0x11b   : > { %v1231_v51 = vrot.slane %v1222_v1, %v1933_v0  ;;  %v1227_v10 = vrot.slane %v1222_v1, %v1948_v31  ;;  %v917_v59 = vadd.f32 %v916_v48, %v909_v35  ;;  %v2827_v1 = vlaneseq }
 0x11d   : > { %1236 = vrot.lane.b32.xlu1 %v1231_v51, %s1590_s25  ;;  %1234 = vrot.lane.b32.xlu0 %v1227_v10, %s1590_s25  ;;  %v925_v26 = vadd.f32 %v924_v9, %v917_v59  ;;  %vm1279_vm9 = vcmp.lt.s32.totalorder %v2827_v1, 256 }
 0x11f   : > { %v933_v34 = vadd.f32 %v932_v22, %v925_v26 }
 0x121   : > { %v942_v44 = vrot.slane %v933_v34, %v1933_v0  ;;  %v938_v56 = vrot.slane %v933_v34, %v1948_v31 }
 0x175   : > { %v648_v52 = vpop.permute.xlu1 %647  ;;  %v646_v61 = vpop.permute.xlu0 %645 }
 0x176   : > { %v651_v18 = vsel %vm649_vm13, %v648_v52, %v646_v61  ;;  %v650_v0 = vsel %vm649_vm13, %v646_v61, %v648_v52 }
 0x177   : > { %v654_v31 = vsel %vm652_vm0, %v651_v18, 0.0 }
 0x179   : > { %v748_v60 = vpop.permute.xlu1 %747  ;;  %v746_v47 = vpop.permute.xlu0 %745 }
 0x17a   : > { %v751_v36 = vsel %vm749_vm14, %v748_v60, %v746_v47  ;;  %v750_v40 = vsel %vm749_vm14, %v746_v47, %v748_v60 }
 0x17b   : > { %v754_v2 = vsel %vm752_vm15, %v751_v36, 0.0  ;;  %v757_v29 = vadd.f32 %v750_v40, %v650_v0 }
 0x17c   : > { %v756_v24 = vadd.f32 %v754_v2, %v654_v31 }
 0x17f   : > { %v848_v15 = vpop.permute.xlu1 %847 }
 0x180   : > { %v846_v21 = vpop.permute.xlu0 %845 }
 0x181   : > { %v850_v33 = vsel %vm849_vm1, %v846_v21, %v848_v15  ;;  %v851_v30 = vsel %vm849_vm1, %v848_v15, %v846_v21 }
 0x182   : > { %v854_v46 = vsel %vm852_vm2, %v851_v30, 0.0  ;;  %v857_v6 = vadd.f32 %v850_v33, %v757_v29 }
 0x183   : > { %v856_v19 = vadd.f32 %v854_v46, %v756_v24  ;;  %v1037_v58 = vpop.permute.xlu1 %1036 }
 0x184   : > { %v1035_v53 = vpop.permute.xlu0 %1034  ;;  %v946_v39 = vadd.f32 %v942_v44, %v857_v6 }
 0x185   : > { %v945_v38 = vadd.f32 %v938_v56, %v856_v19  ;;  %v1039_v11 = vsel %vm1038_vm3, %v1035_v53, %v1037_v58  ;;  %v1040_v43 = vsel %vm1038_vm3, %v1037_v58, %v1035_v53 }
 0x186   : > { %v1044_v41 = vsel %vm1042_vm4, %v1040_v43, 0.0 }
 0x187   : > { %v1045_v37 = vadd.f32 %v1039_v11, %v945_v38  ;;  %v1046_v27 = vadd.f32 %v1044_v41, %v946_v39 }
 0x18a   : > { %v1137_v28 = vpop.permute.xlu1 %1136  ;;  %v1135_v4 = vpop.permute.xlu0 %1134 }
 0x18b   : > { %v1139_v8 = vsel %vm1138_vm5, %v1135_v4, %v1137_v28  ;;  %v1140_v63 = vsel %vm1138_vm5, %v1137_v28, %v1135_v4 }
 0x18c   : > { %v1144_v23 = vsel %vm1142_vm6, %v1140_v63, 0.0  ;;  %v1145_v7 = vadd.f32 %v1139_v8, %v1045_v37 }
 0x18d   : > { %v1146_v14 = vadd.f32 %v1144_v23, %v1046_v27 }
 0x18f   : > { %v1237_v62 = vpop.permute.xlu1 %1236  ;;  %v1235_v17 = vpop.permute.xlu0 %1234 }
 0x190   : > { %v1239_v13 = vsel %vm1238_vm7, %v1235_v17, %v1237_v62  ;;  %v1240_v57 = vsel %vm1238_vm7, %v1237_v62, %v1235_v17 }
 0x191   : > { %v1244_v32 = vsel %vm1242_vm8, %v1240_v57, 0.0  ;;  %v1245_v45 = vadd.f32 %v1239_v13, %v1145_v7 }
 0x192   : > { %v1246_v25 = vadd.f32 %v1244_v32, %v1146_v14 }
 0x193   : > { %v1472_v48 = vmul.f32 -1.442695, %v1245_v45 }
 0x194   : > { %v1473_v9 = vmul.f32 -1.442695, %v1246_v25 }
 0x195   : > { %1526 = vpow2.f32 %v1472_v48 }
 0x196   : > { %1528 = vpow2.f32 %v1473_v9 }
 0x1a2   : > { %v1527_v12 = vpop.eup %1526 }
 0x1a3   : > { %v1529_v20 = vpop.eup %1528  ;;  %v1253_v3 = vadd.f32 1.0, %v1527_v12 }
 0x1a4   : > { %v1254_v49 = vadd.f32 1.0, %v1529_v20 }
 0x1a5   : > { %1530 = vrcp.f32 %v1253_v3 }
 0x1a6   : > { %1532 = vrcp.f32 %v1254_v49 }
 0x1b2   : > { %v1531_v55 = vpop.eup %1530 }
 0x1b3   : > { %v1533_v16 = vpop.eup %1532 }
 0x1b4   : > { %v1261_v54 = vcombine.low %v1531_v55, %v1533_v16 }
 0x1b6   : > { %v1268_v22 = vrot.slane %v1261_v54, %v1836_v50 }
 0x1b8   : > { %v1275_v42 = vrot.slane %v1268_v22, %v1836_v50 }
 0x1ba   : > { %1281 = vst.msk [vmem:[%s208_s30] sm:$0x3] %vm1279_vm9, %v1275_v42 }
 0x1bb PF: > { %s2828_s10 = sld [smem:[#allocation8_spill]] }
 0x1bc   : > { %s2829_s12 = sld [smem:[#allocation7_spill]] }
 0x1bd   : > { %s2830_s13 = sld [smem:[#allocation9_spill]] }
 0x1c1   : > { %s14_s14 = sadd.s32 1, %s2828_s10  }
 0x1c2   : > { %p11_p2 = scmp.ge.s32.totalorder %s14_s14, 4  }
 0x1c4   :  { %13 = sbr.rel (!%p11_p2) target bundleno = 7 (0x7), region = 67 }
 0x1c9   :  { %1301 = vsyncpa [#allocation5], 1 }
 0x1ca   :  { %1303 = vsyncpa [#allocation5 + $0x1], 1 }

</bundles_post_ra>
